<compile_context>
chip_gen: v7x
topology: tpu7x:2x2x1
jax: 0.10.0
libtpu: 0.0.40
codegen_flags: <defaults>
</compile_context>

<pallas_src>
import numpy as np
import jax
import jax.numpy as jnp
from jax.experimental import pallas as pl
from jax.experimental.pallas import tpu as pltpu

N_WIRES = 4
DIM = 2 ** N_WIRES          # 16
_INV_SQRT2 = float(1.0 / np.sqrt(2.0))


# ----------------------- host-side constant matrices ------------------------
def _kron_wire(g, q, n=N_WIRES):
    m = np.eye(1)
    for w in range(n):
        m = np.kron(m, g if w == q else np.eye(2))
    return m


def _cnot(control, target, n=N_WIRES):
    dim = 2 ** n
    M = np.zeros((dim, dim))
    for b in range(dim):
        bits = [(b >> (n - 1 - w)) & 1 for w in range(n)]
        if bits[control] == 1:
            bits[target] ^= 1
        b2 = 0
        for w, bit in enumerate(bits):
            b2 |= bit << (n - 1 - w)
        M[b2, b] = 1.0
    return M


_X2 = np.array([[0.0, 1.0], [1.0, 0.0]])
# Bit-flip permutation matrix per wire (X on wire q); symmetric 16x16.
PERM = np.stack([_kron_wire(_X2, q) for q in range(N_WIRES)]).astype(np.float32)


# --------------------------------- kernel -----------------------------------
def _fidelity_kernel(xc_ref, ac_ref,
                     w1_ref, b1_ref, w2_ref, b2_ref, w3_ref, b3_ref,
                     perm_ref, out_ref):
    # xc_ref: (4, 2*TB) f32   -- columns [0:TB] = x1 tile, [TB:2TB] = x2 tile
    # ac_ref: (4, 2*TB) int32 -- matching action sequences
    # perm_ref: (4, 16, 16) f32 constant bit-flip permutations
    # out_ref: (1, TB) f32 fidelities (lane-dense)
    TB = out_ref.shape[-1]
    T2 = 2 * TB

    xT = xc_ref[...]                                  # (4, 2TB)
    acts = ac_ref[...]                                # (4, 2TB) int32

    # MLP (transposed: samples in lanes): h = relu(W x + b)
    h = jnp.maximum(
        jnp.dot(w1_ref[...], xT, preferred_element_type=jnp.float32) + b1_ref[...], 0.0)
    h = jnp.maximum(
        jnp.dot(w2_ref[...], h, preferred_element_type=jnp.float32) + b2_ref[...], 0.0)
    ang = jnp.dot(w3_ref[...], h, preferred_element_type=jnp.float32) + b3_ref[...]  # (4, 2TB)

    cos_a = jnp.cos(0.5 * ang)
    sin_a = jnp.sin(0.5 * ang)

    amp_idx = jax.lax.broadcasted_iota(jnp.int32, (DIM, 1), 0)      # (16, 1)
    inv_sqrt2 = jnp.float32(_INV_SQRT2)

    # |0000> for every column (both psi1 and psi2 halves)
    re = jnp.broadcast_to((amp_idx == 0).astype(jnp.float32), (DIM, T2))
    im = jnp.zeros((DIM, T2), jnp.float32)

    for q in range(N_WIRES):                          # static unroll over wires
        t = (q + 1) % N_WIRES                         # CNOT target wire
        a = acts[q:q + 1, :]                          # (1, 2TB)
        cq = cos_a[q:q + 1, :]
        sq = sin_a[q:q + 1, :]
        is_h = (a == 0).astype(jnp.float32)
        is_rx = (a == 1).astype(jnp.float32)
        is_ry = (a == 2).astype(jnp.float32)
        is_rz = (a == 3).astype(jnp.float32)
        is_cn = (a == 4).astype(jnp.float32)
        is_id = 1.0 - (is_h + is_rx + is_ry + is_rz + is_cn)        # None/-1 => I

        bitq = ((amp_idx >> (N_WIRES - 1 - q)) & 1).astype(jnp.float32)   # (16,1)
        signq = 1.0 - 2.0 * bitq                                          # +1 / -1

        # bit-flip copies of the state (constant-permutation matmuls on MXU)
        re_fq = jnp.dot(perm_ref[q], re, preferred_element_type=jnp.float32)
        im_fq = jnp.dot(perm_ref[q], im, preferred_element_type=jnp.float32)
        re_ft = jnp.dot(perm_ref[t], re, preferred_element_type=jnp.float32)
        im_ft = jnp.dot(perm_ref[t], im, preferred_element_type=jnp.float32)

        # per-element complex gate coefficients: new = A*psi + B*psi_flip_q + C*psi_flip_t
        a_re = (is_id
                + (is_rx + is_ry + is_rz) * cq
                + is_h * (inv_sqrt2 * signq)
                + is_cn * (1.0 - bitq))
        a_im = is_rz * (-sq) * signq
        b_re = is_h * inv_sqrt2 + is_ry * (-sq) * signq
        b_im = is_rx * (-sq)
        c_re = is_cn * bitq

        new_re = a_re * re - a_im * im + b_re * re_fq - b_im * im_fq + c_re * re_ft
        new_im = a_re * im + a_im * re + b_re * im_fq + b_im * re_fq + c_re * im_ft
        re, im = new_re, new_im

    re1, re2 = re[:, :TB], re[:, TB:]
    im1, im2 = im[:, :TB], im[:, TB:]
    # |<psi2|psi1>|^2  ==  probs[0] of U2^dagger U1 |0>
    ov_r = jnp.sum(re2 * re1 + im2 * im1, axis=0, keepdims=True)    # (1, TB)
    ov_i = jnp.sum(re2 * im1 - im2 * re1, axis=0, keepdims=True)
    out_ref[...] = ov_r * ov_r + ov_i * ov_i


# --------------------------------- wrapper ----------------------------------
def model_fidelity_forward(x1_batch, x2_batch, acts1, acts2, params, tb=128):
    w1, b1, w2, b2, w3, b3 = params
    B = x1_batch.shape[0]
    n_tiles = max(1, pl.cdiv(B, tb))
    padded_B = n_tiles * tb
    pad = padded_B - B

    def prep_x(x):
        x = jnp.asarray(x, jnp.float32).reshape(B, N_WIRES)
        x = jnp.pad(x, ((0, pad), (0, 0)))
        return x.T.reshape(N_WIRES, n_tiles, tb)                    # (4, nt, TB)

    def prep_a(a):
        a = jnp.asarray(a, jnp.int32).reshape(B, N_WIRES)
        a = jnp.pad(a, ((0, pad), (0, 0)), constant_values=-1)      # pad => identity
        return a.T.reshape(N_WIRES, n_tiles, tb)

    # interleave per tile: block t covers [x1 tile t | x2 tile t]
    xc = jnp.stack([prep_x(x1_batch), prep_x(x2_batch)], axis=2)    # (4, nt, 2, TB)
    xc = xc.reshape(N_WIRES, 2 * padded_B)
    ac = jnp.stack([prep_a(acts1), prep_a(acts2)], axis=2)
    ac = ac.reshape(N_WIRES, 2 * padded_B)

    full2 = lambda i: (0, 0)
    full3 = lambda i: (0, 0, 0)
    tile2 = lambda i: (0, i)

    out = pl.pallas_call(
        _fidelity_kernel,
        out_shape=jax.ShapeDtypeStruct((1, padded_B), jnp.float32),
        grid=(n_tiles,),
        in_specs=[
            pl.BlockSpec((N_WIRES, 2 * tb), tile2),        # fused x1|x2 tile
            pl.BlockSpec((N_WIRES, 2 * tb), tile2),        # fused acts1|acts2 tile
            pl.BlockSpec((8, 4), full2),                   # W1 (out,in)
            pl.BlockSpec((8, 1), full2),                   # b1
            pl.BlockSpec((8, 8), full2),                   # W2
            pl.BlockSpec((8, 1), full2),                   # b2
            pl.BlockSpec((4, 8), full2),                   # W3
            pl.BlockSpec((4, 1), full2),                   # b3
            pl.BlockSpec((N_WIRES, DIM, DIM), full3),      # bit-flip permutations
        ],
        out_specs=pl.BlockSpec((1, tb), tile2),
        compiler_params=pltpu.CompilerParams(dimension_semantics=("parallel",)),
    )(xc, ac,
      jnp.asarray(w1, jnp.float32), jnp.asarray(b1, jnp.float32).reshape(8, 1),
      jnp.asarray(w2, jnp.float32), jnp.asarray(b2, jnp.float32).reshape(8, 1),
      jnp.asarray(w3, jnp.float32), jnp.asarray(b3, jnp.float32).reshape(4, 1),
      jnp.asarray(PERM))
    return out[0, :B]


# --------------------------- pure numpy reference ---------------------------
def _reference(x1b, x2b, a1b, a2b, params):
    w1, b1, w2, b2, w3, b3 = [np.asarray(p, np.float64) for p in params]
    X2 = np.array([[0, 1], [1, 0]], complex)
    Y2 = np.array([[0, -1j], [1j, 0]], complex)
    Z2 = np.array([[1, 0], [0, -1]], complex)
    H2 = np.array([[1, 1], [1, -1]], complex) / np.sqrt(2.0)

    def mlp(x):
        h = np.maximum(x @ w1.T + b1, 0.0)
        h = np.maximum(h @ w2.T + b2, 0.0)
        return h @ w3.T + b3

    def embed(actions, angles):
        psi = np.zeros(DIM, complex)
        psi[0] = 1.0
        for q, a in enumerate(actions):
            th = angles[q]
            if a == 0:
                U = _kron_wire(H2, q)
            elif a == 1:
                U = np.cos(th / 2) * np.eye(DIM) - 1j * np.sin(th / 2) * _kron_wire(X2, q)
            elif a == 2:
                U = np.cos(th / 2) * np.eye(DIM) - 1j * np.sin(th / 2) * _kron_wire(Y2, q)
            elif a == 3:
                U = np.cos(th / 2) * np.eye(DIM) - 1j * np.sin(th / 2) * _kron_wire(Z2, q)
            elif a == 4:
                U = _cnot(q, (q + 1) % N_WIRES).astype(complex)
            else:
                U = np.eye(DIM, dtype=complex)
            psi = U @ psi
        return psi

    out = []
    for i in range(len(x1b)):
        ang1 = mlp(np.asarray(x1b[i], np.float64))
        ang2 = mlp(np.asarray(x2b[i], np.float64))
        psi1 = embed(list(a1b[i]), ang1)
        psi2 = embed(list(a2b[i]), ang2)
        out.append(np.abs(np.vdot(psi2, psi1)) ** 2)
    return np.array(out)


# ----------------------------------- main ------------------------------------
if __name__ == "__main__":
    key = jax.random.PRNGKey(0)
    k_x1, k_x2, k_p = jax.random.split(key, 3)

    B = 2
    x1_batch = jax.random.normal(k_x1, (B, 4), jnp.float32)
    x2_batch = jax.random.normal(k_x2, (B, 4), jnp.float32)

    # actions: 0=H, 1=RX, 2=RY, 3=RZ, 4=CNOT, -1=None/Identity
    acts1 = np.array([[0, 1, 4, 2],
                      [3, -1, 1, 0]], dtype=np.int32)
    acts2 = np.array([[1, 2, 0, 4],
                      [4, 0, 3, 2]], dtype=np.int32)

    pk = jax.random.split(k_p, 6)
    params = (
        jax.random.normal(pk[0], (8, 4), jnp.float32) * 0.5,   # Linear(4, 8) weight (out, in)
        jax.random.normal(pk[1], (8,), jnp.float32) * 0.1,
        jax.random.normal(pk[2], (8, 8), jnp.float32) * 0.5,   # Linear(8, 8)
        jax.random.normal(pk[3], (8,), jnp.float32) * 0.1,
        jax.random.normal(pk[4], (4, 8), jnp.float32) * 0.5,   # Linear(8, 4)
        jax.random.normal(pk[5], (4,), jnp.float32) * 0.1,
    )

    out = model_fidelity_forward(x1_batch, x2_batch, acts1, acts2, params)
    out = jax.block_until_ready(out)

    ref = _reference(np.asarray(x1_batch), np.asarray(x2_batch), acts1, acts2, params)
    np.testing.assert_allclose(np.asarray(out), ref, atol=5e-2, rtol=5e-2)

    print("KERNEL_OK")
</pallas_src>

<mosaic_0001>
module attributes {stable_mosaic.version = 11 : i64} {
  func.func @_fidelity_kernel(%arg0: i32, %arg1: memref<4x256xf32, #tpu.memory_space<vmem>>, %arg2: memref<4x256xi32, #tpu.memory_space<vmem>>, %arg3: memref<8x4xf32, #tpu.memory_space<vmem>>, %arg4: memref<8x1xf32, #tpu.memory_space<vmem>>, %arg5: memref<8x8xf32, #tpu.memory_space<vmem>>, %arg6: memref<8x1xf32, #tpu.memory_space<vmem>>, %arg7: memref<4x8xf32, #tpu.memory_space<vmem>>, %arg8: memref<4x1xf32, #tpu.memory_space<vmem>>, %arg9: memref<4x16x16xf32, #tpu.memory_space<vmem>>, %arg10: memref<1x128xf32, #tpu.memory_space<vmem>>) attributes {dimension_semantics = [#tpu.dimension_semantics<parallel>], iteration_bounds = array<i64: 1>, scalar_prefetch = 0 : i64, scratch_operands = 0 : i64, tpu.core_type = #tpu.core_type<tc>, window_params = [{transform_indices = @transform_0, window_bounds = array<i64: 4, 256>}, {transform_indices = @transform_1, window_bounds = array<i64: 4, 256>}, {pipeline_mode = #tpu.pipeline_mode<synchronous>, transform_indices = @transform_2, window_bounds = array<i64: 8, 4>}, {pipeline_mode = #tpu.pipeline_mode<synchronous>, transform_indices = @transform_3, window_bounds = array<i64: 8, 1>}, {pipeline_mode = #tpu.pipeline_mode<synchronous>, transform_indices = @transform_4, window_bounds = array<i64: 8, 8>}, {pipeline_mode = #tpu.pipeline_mode<synchronous>, transform_indices = @transform_5, window_bounds = array<i64: 8, 1>}, {pipeline_mode = #tpu.pipeline_mode<synchronous>, transform_indices = @transform_6, window_bounds = array<i64: 4, 8>}, {pipeline_mode = #tpu.pipeline_mode<synchronous>, transform_indices = @transform_7, window_bounds = array<i64: 4, 1>}, {pipeline_mode = #tpu.pipeline_mode<synchronous>, transform_indices = @transform_8, window_bounds = array<i64: 4, 16, 16>}, {transform_indices = @transform_9, window_bounds = array<i64: 1, 128>}]} {
    %c0 = arith.constant 0 : index
    %c0_0 = arith.constant 0 : index
    %0 = vector.load %arg1[%c0, %c0_0] : memref<4x256xf32, #tpu.memory_space<vmem>>, vector<4x256xf32>
    %c0_1 = arith.constant 0 : index
    %c0_2 = arith.constant 0 : index
    %1 = vector.load %arg2[%c0_1, %c0_2] : memref<4x256xi32, #tpu.memory_space<vmem>>, vector<4x256xi32>
    %c0_3 = arith.constant 0 : index
    %c0_4 = arith.constant 0 : index
    %2 = vector.load %arg3[%c0_3, %c0_4] : memref<8x4xf32, #tpu.memory_space<vmem>>, vector<8x4xf32>
    %cst = arith.constant dense<0.000000e+00> : vector<8x256xf32>
    %3 = tpu.matmul %2, %0, %cst {dimension_numbers = #tpu.dot_dimension_numbers<[1], [0], [0], [1], [0, 0, 1, 1], [], []>} : vector<8x4xf32>, vector<4x256xf32>, vector<8x256xf32> -> vector<8x256xf32>
    %c0_5 = arith.constant 0 : index
    %c0_6 = arith.constant 0 : index
    %4 = vector.load %arg4[%c0_5, %c0_6] : memref<8x1xf32, #tpu.memory_space<vmem>>, vector<8x1xf32>
    %5 = vector.broadcast %4 : vector<8x1xf32> to vector<8x256xf32>
    %6 = arith.addf %3, %5 : vector<8x256xf32>
    %cst_7 = arith.constant 0.000000e+00 : f32
    %7 = vector.broadcast %cst_7 : f32 to vector<8x256xf32>
    %8 = arith.maximumf %6, %7 : vector<8x256xf32>
    %c0_8 = arith.constant 0 : index
    %c0_9 = arith.constant 0 : index
    %9 = vector.load %arg5[%c0_8, %c0_9] : memref<8x8xf32, #tpu.memory_space<vmem>>, vector<8x8xf32>
    %cst_10 = arith.constant dense<0.000000e+00> : vector<8x256xf32>
    %10 = tpu.matmul %9, %8, %cst_10 {dimension_numbers = #tpu.dot_dimension_numbers<[1], [0], [0], [1], [0, 0, 1, 1], [], []>} : vector<8x8xf32>, vector<8x256xf32>, vector<8x256xf32> -> vector<8x256xf32>
    %c0_11 = arith.constant 0 : index
    %c0_12 = arith.constant 0 : index
    %11 = vector.load %arg6[%c0_11, %c0_12] : memref<8x1xf32, #tpu.memory_space<vmem>>, vector<8x1xf32>
    %12 = vector.broadcast %11 : vector<8x1xf32> to vector<8x256xf32>
    %13 = arith.addf %10, %12 : vector<8x256xf32>
    %cst_13 = arith.constant 0.000000e+00 : f32
    %14 = vector.broadcast %cst_13 : f32 to vector<8x256xf32>
    %15 = arith.maximumf %13, %14 : vector<8x256xf32>
    %c0_14 = arith.constant 0 : index
    %c0_15 = arith.constant 0 : index
    %16 = vector.load %arg7[%c0_14, %c0_15] : memref<4x8xf32, #tpu.memory_space<vmem>>, vector<4x8xf32>
    %cst_16 = arith.constant dense<0.000000e+00> : vector<4x256xf32>
    %17 = tpu.matmul %16, %15, %cst_16 {dimension_numbers = #tpu.dot_dimension_numbers<[1], [0], [0], [1], [0, 0, 1, 1], [], []>} : vector<4x8xf32>, vector<8x256xf32>, vector<4x256xf32> -> vector<4x256xf32>
    %c0_17 = arith.constant 0 : index
    %c0_18 = arith.constant 0 : index
    %18 = vector.load %arg8[%c0_17, %c0_18] : memref<4x1xf32, #tpu.memory_space<vmem>>, vector<4x1xf32>
    %19 = vector.broadcast %18 : vector<4x1xf32> to vector<4x256xf32>
    %20 = arith.addf %17, %19 : vector<4x256xf32>
    %cst_19 = arith.constant 5.000000e-01 : f32
    %21 = vector.broadcast %cst_19 : f32 to vector<4x256xf32>
    %22 = arith.mulf %21, %20 : vector<4x256xf32>
    %23 = math.cos %22 : vector<4x256xf32>
    %cst_20 = arith.constant 5.000000e-01 : f32
    %24 = vector.broadcast %cst_20 : f32 to vector<4x256xf32>
    %25 = arith.mulf %24, %20 : vector<4x256xf32>
    %26 = math.sin %25 : vector<4x256xf32>
    %27 = tpu.iota {dimensions = array<i32: 0>} : vector<16x1xi32>
    %c0_i32 = arith.constant 0 : i32
    %28 = vector.broadcast %c0_i32 : i32 to vector<16x1xi32>
    %29 = arith.cmpi eq, %27, %28 : vector<16x1xi32>
    %30 = arith.extui %29 : vector<16x1xi1> to vector<16x1xi32>
    %31 = arith.sitofp %30 : vector<16x1xi32> to vector<16x1xf32>
    %32 = vector.shape_cast %31 : vector<16x1xf32> to vector<16x1xf32>
    %33 = vector.broadcast %32 : vector<16x1xf32> to vector<16x256xf32>
    %cst_21 = arith.constant 0.000000e+00 : f32
    %34 = vector.broadcast %cst_21 : f32 to vector<16x256xf32>
    %35 = vector.extract_strided_slice %1 {offsets = [0, 0], sizes = [1, 256], strides = [1, 1]} : vector<4x256xi32> to vector<1x256xi32>
    %36 = vector.extract_strided_slice %23 {offsets = [0, 0], sizes = [1, 256], strides = [1, 1]} : vector<4x256xf32> to vector<1x256xf32>
    %37 = vector.extract_strided_slice %26 {offsets = [0, 0], sizes = [1, 256], strides = [1, 1]} : vector<4x256xf32> to vector<1x256xf32>
    %c0_i32_22 = arith.constant 0 : i32
    %38 = vector.broadcast %c0_i32_22 : i32 to vector<1x256xi32>
    %39 = arith.cmpi eq, %35, %38 : vector<1x256xi32>
    %40 = arith.extui %39 : vector<1x256xi1> to vector<1x256xi32>
    %41 = arith.sitofp %40 : vector<1x256xi32> to vector<1x256xf32>
    %c1_i32 = arith.constant 1 : i32
    %42 = vector.broadcast %c1_i32 : i32 to vector<1x256xi32>
    %43 = arith.cmpi eq, %35, %42 : vector<1x256xi32>
    %44 = arith.extui %43 : vector<1x256xi1> to vector<1x256xi32>
    %45 = arith.sitofp %44 : vector<1x256xi32> to vector<1x256xf32>
    %c2_i32 = arith.constant 2 : i32
    %46 = vector.broadcast %c2_i32 : i32 to vector<1x256xi32>
    %47 = arith.cmpi eq, %35, %46 : vector<1x256xi32>
    %48 = arith.extui %47 : vector<1x256xi1> to vector<1x256xi32>
    %49 = arith.sitofp %48 : vector<1x256xi32> to vector<1x256xf32>
    %c3_i32 = arith.constant 3 : i32
    %50 = vector.broadcast %c3_i32 : i32 to vector<1x256xi32>
    %51 = arith.cmpi eq, %35, %50 : vector<1x256xi32>
    %52 = arith.extui %51 : vector<1x256xi1> to vector<1x256xi32>
    %53 = arith.sitofp %52 : vector<1x256xi32> to vector<1x256xf32>
    %c4_i32 = arith.constant 4 : i32
    %54 = vector.broadcast %c4_i32 : i32 to vector<1x256xi32>
    %55 = arith.cmpi eq, %35, %54 : vector<1x256xi32>
    %56 = arith.extui %55 : vector<1x256xi1> to vector<1x256xi32>
    %57 = arith.sitofp %56 : vector<1x256xi32> to vector<1x256xf32>
    %58 = arith.addf %41, %45 : vector<1x256xf32>
    %59 = arith.addf %58, %49 : vector<1x256xf32>
    %60 = arith.addf %59, %53 : vector<1x256xf32>
    %61 = arith.addf %60, %57 : vector<1x256xf32>
    %cst_23 = arith.constant 1.000000e+00 : f32
    %62 = vector.broadcast %cst_23 : f32 to vector<1x256xf32>
    %63 = arith.subf %62, %61 : vector<1x256xf32>
    %c3_i32_24 = arith.constant 3 : i32
    %64 = vector.broadcast %c3_i32_24 : i32 to vector<16x1xi32>
    %65 = arith.shrsi %27, %64 : vector<16x1xi32>
    %c1_i32_25 = arith.constant 1 : i32
    %66 = vector.broadcast %c1_i32_25 : i32 to vector<16x1xi32>
    %67 = arith.andi %65, %66 : vector<16x1xi32>
    %68 = arith.sitofp %67 : vector<16x1xi32> to vector<16x1xf32>
    %cst_26 = arith.constant 2.000000e+00 : f32
    %69 = vector.broadcast %cst_26 : f32 to vector<16x1xf32>
    %70 = arith.mulf %69, %68 : vector<16x1xf32>
    %cst_27 = arith.constant 1.000000e+00 : f32
    %71 = vector.broadcast %cst_27 : f32 to vector<16x1xf32>
    %72 = arith.subf %71, %70 : vector<16x1xf32>
    %c0_28 = arith.constant 0 : index
    %c0_29 = arith.constant 0 : index
    %c0_30 = arith.constant 0 : index
    %73 = vector.load %arg9[%c0_28, %c0_29, %c0_30] : memref<4x16x16xf32, #tpu.memory_space<vmem>>, vector<1x16x16xf32>
    %74 = vector.shape_cast %73 : vector<1x16x16xf32> to vector<16x16xf32>
    %cst_31 = arith.constant dense<0.000000e+00> : vector<16x256xf32>
    %75 = tpu.matmul %74, %33, %cst_31 {dimension_numbers = #tpu.dot_dimension_numbers<[1], [0], [0], [1], [0, 0, 1, 1], [], []>} : vector<16x16xf32>, vector<16x256xf32>, vector<16x256xf32> -> vector<16x256xf32>
    %c0_32 = arith.constant 0 : index
    %c0_33 = arith.constant 0 : index
    %c0_34 = arith.constant 0 : index
    %76 = vector.load %arg9[%c0_32, %c0_33, %c0_34] : memref<4x16x16xf32, #tpu.memory_space<vmem>>, vector<1x16x16xf32>
    %77 = vector.shape_cast %76 : vector<1x16x16xf32> to vector<16x16xf32>
    %cst_35 = arith.constant dense<0.000000e+00> : vector<16x256xf32>
    %78 = tpu.matmul %77, %34, %cst_35 {dimension_numbers = #tpu.dot_dimension_numbers<[1], [0], [0], [1], [0, 0, 1, 1], [], []>} : vector<16x16xf32>, vector<16x256xf32>, vector<16x256xf32> -> vector<16x256xf32>
    %c1 = arith.constant 1 : index
    %c0_36 = arith.constant 0 : index
    %c0_37 = arith.constant 0 : index
    %79 = vector.load %arg9[%c1, %c0_36, %c0_37] : memref<4x16x16xf32, #tpu.memory_space<vmem>>, vector<1x16x16xf32>
    %80 = vector.shape_cast %79 : vector<1x16x16xf32> to vector<16x16xf32>
    %cst_38 = arith.constant dense<0.000000e+00> : vector<16x256xf32>
    %81 = tpu.matmul %80, %33, %cst_38 {dimension_numbers = #tpu.dot_dimension_numbers<[1], [0], [0], [1], [0, 0, 1, 1], [], []>} : vector<16x16xf32>, vector<16x256xf32>, vector<16x256xf32> -> vector<16x256xf32>
    %c1_39 = arith.constant 1 : index
    %c0_40 = arith.constant 0 : index
    %c0_41 = arith.constant 0 : index
    %82 = vector.load %arg9[%c1_39, %c0_40, %c0_41] : memref<4x16x16xf32, #tpu.memory_space<vmem>>, vector<1x16x16xf32>
    %83 = vector.shape_cast %82 : vector<1x16x16xf32> to vector<16x16xf32>
    %cst_42 = arith.constant dense<0.000000e+00> : vector<16x256xf32>
    %84 = tpu.matmul %83, %34, %cst_42 {dimension_numbers = #tpu.dot_dimension_numbers<[1], [0], [0], [1], [0, 0, 1, 1], [], []>} : vector<16x16xf32>, vector<16x256xf32>, vector<16x256xf32> -> vector<16x256xf32>
    %85 = arith.addf %45, %49 : vector<1x256xf32>
    %86 = arith.addf %85, %53 : vector<1x256xf32>
    %87 = arith.mulf %86, %36 : vector<1x256xf32>
    %88 = arith.addf %63, %87 : vector<1x256xf32>
    %cst_43 = arith.constant 0.707106769 : f32
    %89 = vector.broadcast %cst_43 : f32 to vector<16x1xf32>
    %90 = arith.mulf %89, %72 : vector<16x1xf32>
    %91 = vector.broadcast %41 : vector<1x256xf32> to vector<16x256xf32>
    %92 = vector.broadcast %90 : vector<16x1xf32> to vector<16x256xf32>
    %93 = arith.mulf %91, %92 : vector<16x256xf32>
    %94 = vector.broadcast %88 : vector<1x256xf32> to vector<16x256xf32>
    %95 = arith.addf %94, %93 : vector<16x256xf32>
    %cst_44 = arith.constant 1.000000e+00 : f32
    %96 = vector.broadcast %cst_44 : f32 to vector<16x1xf32>
    %97 = arith.subf %96, %68 : vector<16x1xf32>
    %98 = vector.broadcast %57 : vector<1x256xf32> to vector<16x256xf32>
    %99 = vector.broadcast %97 : vector<16x1xf32> to vector<16x256xf32>
    %100 = arith.mulf %98, %99 : vector<16x256xf32>
    %101 = arith.addf %95, %100 : vector<16x256xf32>
    %cst_45 = arith.constant 0.000000e+00 : f32
    %102 = vector.broadcast %cst_45 : f32 to vector<1x256xf32>
    %103 = arith.subf %102, %37 : vector<1x256xf32>
    %104 = arith.mulf %53, %103 : vector<1x256xf32>
    %105 = vector.broadcast %104 : vector<1x256xf32> to vector<16x256xf32>
    %106 = vector.broadcast %72 : vector<16x1xf32> to vector<16x256xf32>
    %107 = arith.mulf %105, %106 : vector<16x256xf32>
    %cst_46 = arith.constant 0.707106769 : f32
    %108 = vector.broadcast %cst_46 : f32 to vector<1x256xf32>
    %109 = arith.mulf %41, %108 : vector<1x256xf32>
    %cst_47 = arith.constant 0.000000e+00 : f32
    %110 = vector.broadcast %cst_47 : f32 to vector<1x256xf32>
    %111 = arith.subf %110, %37 : vector<1x256xf32>
    %112 = arith.mulf %49, %111 : vector<1x256xf32>
    %113 = vector.broadcast %112 : vector<1x256xf32> to vector<16x256xf32>
    %114 = vector.broadcast %72 : vector<16x1xf32> to vector<16x256xf32>
    %115 = arith.mulf %113, %114 : vector<16x256xf32>
    %116 = vector.broadcast %109 : vector<1x256xf32> to vector<16x256xf32>
    %117 = arith.addf %116, %115 : vector<16x256xf32>
    %cst_48 = arith.constant 0.000000e+00 : f32
    %118 = vector.broadcast %cst_48 : f32 to vector<1x256xf32>
    %119 = arith.subf %118, %37 : vector<1x256xf32>
    %120 = arith.mulf %45, %119 : vector<1x256xf32>
    %121 = vector.broadcast %57 : vector<1x256xf32> to vector<16x256xf32>
    %122 = vector.broadcast %68 : vector<16x1xf32> to vector<16x256xf32>
    %123 = arith.mulf %121, %122 : vector<16x256xf32>
    %124 = arith.mulf %101, %33 : vector<16x256xf32>
    %125 = arith.mulf %107, %34 : vector<16x256xf32>
    %126 = arith.subf %124, %125 : vector<16x256xf32>
    %127 = arith.mulf %117, %75 : vector<16x256xf32>
    %128 = arith.addf %126, %127 : vector<16x256xf32>
    %129 = vector.broadcast %120 : vector<1x256xf32> to vector<16x256xf32>
    %130 = arith.mulf %129, %78 : vector<16x256xf32>
    %131 = arith.subf %128, %130 : vector<16x256xf32>
    %132 = arith.mulf %123, %81 : vector<16x256xf32>
    %133 = arith.addf %131, %132 : vector<16x256xf32>
    %134 = arith.mulf %101, %34 : vector<16x256xf32>
    %135 = arith.mulf %107, %33 : vector<16x256xf32>
    %136 = arith.addf %134, %135 : vector<16x256xf32>
    %137 = arith.mulf %117, %78 : vector<16x256xf32>
    %138 = arith.addf %136, %137 : vector<16x256xf32>
    %139 = vector.broadcast %120 : vector<1x256xf32> to vector<16x256xf32>
    %140 = arith.mulf %139, %75 : vector<16x256xf32>
    %141 = arith.addf %138, %140 : vector<16x256xf32>
    %142 = arith.mulf %123, %84 : vector<16x256xf32>
    %143 = arith.addf %141, %142 : vector<16x256xf32>
    %144 = vector.extract_strided_slice %1 {offsets = [1, 0], sizes = [1, 256], strides = [1, 1]} : vector<4x256xi32> to vector<1x256xi32>
    %145 = vector.extract_strided_slice %23 {offsets = [1, 0], sizes = [1, 256], strides = [1, 1]} : vector<4x256xf32> to vector<1x256xf32>
    %146 = vector.extract_strided_slice %26 {offsets = [1, 0], sizes = [1, 256], strides = [1, 1]} : vector<4x256xf32> to vector<1x256xf32>
    %c0_i32_49 = arith.constant 0 : i32
    %147 = vector.broadcast %c0_i32_49 : i32 to vector<1x256xi32>
    %148 = arith.cmpi eq, %144, %147 : vector<1x256xi32>
    %149 = arith.extui %148 : vector<1x256xi1> to vector<1x256xi32>
    %150 = arith.sitofp %149 : vector<1x256xi32> to vector<1x256xf32>
    %c1_i32_50 = arith.constant 1 : i32
    %151 = vector.broadcast %c1_i32_50 : i32 to vector<1x256xi32>
    %152 = arith.cmpi eq, %144, %151 : vector<1x256xi32>
    %153 = arith.extui %152 : vector<1x256xi1> to vector<1x256xi32>
    %154 = arith.sitofp %153 : vector<1x256xi32> to vector<1x256xf32>
    %c2_i32_51 = arith.constant 2 : i32
    %155 = vector.broadcast %c2_i32_51 : i32 to vector<1x256xi32>
    %156 = arith.cmpi eq, %144, %155 : vector<1x256xi32>
    %157 = arith.extui %156 : vector<1x256xi1> to vector<1x256xi32>
    %158 = arith.sitofp %157 : vector<1x256xi32> to vector<1x256xf32>
    %c3_i32_52 = arith.constant 3 : i32
    %159 = vector.broadcast %c3_i32_52 : i32 to vector<1x256xi32>
    %160 = arith.cmpi eq, %144, %159 : vector<1x256xi32>
    %161 = arith.extui %160 : vector<1x256xi1> to vector<1x256xi32>
    %162 = arith.sitofp %161 : vector<1x256xi32> to vector<1x256xf32>
    %c4_i32_53 = arith.constant 4 : i32
    %163 = vector.broadcast %c4_i32_53 : i32 to vector<1x256xi32>
    %164 = arith.cmpi eq, %144, %163 : vector<1x256xi32>
    %165 = arith.extui %164 : vector<1x256xi1> to vector<1x256xi32>
    %166 = arith.sitofp %165 : vector<1x256xi32> to vector<1x256xf32>
    %167 = arith.addf %150, %154 : vector<1x256xf32>
    %168 = arith.addf %167, %158 : vector<1x256xf32>
    %169 = arith.addf %168, %162 : vector<1x256xf32>
    %170 = arith.addf %169, %166 : vector<1x256xf32>
    %cst_54 = arith.constant 1.000000e+00 : f32
    %171 = vector.broadcast %cst_54 : f32 to vector<1x256xf32>
    %172 = arith.subf %171, %170 : vector<1x256xf32>
    %c2_i32_55 = arith.constant 2 : i32
    %173 = vector.broadcast %c2_i32_55 : i32 to vector<16x1xi32>
    %174 = arith.shrsi %27, %173 : vector<16x1xi32>
    %c1_i32_56 = arith.constant 1 : i32
    %175 = vector.broadcast %c1_i32_56 : i32 to vector<16x1xi32>
    %176 = arith.andi %174, %175 : vector<16x1xi32>
    %177 = arith.sitofp %176 : vector<16x1xi32> to vector<16x1xf32>
    %cst_57 = arith.constant 2.000000e+00 : f32
    %178 = vector.broadcast %cst_57 : f32 to vector<16x1xf32>
    %179 = arith.mulf %178, %177 : vector<16x1xf32>
    %cst_58 = arith.constant 1.000000e+00 : f32
    %180 = vector.broadcast %cst_58 : f32 to vector<16x1xf32>
    %181 = arith.subf %180, %179 : vector<16x1xf32>
    %c1_59 = arith.constant 1 : index
    %c0_60 = arith.constant 0 : index
    %c0_61 = arith.constant 0 : index
    %182 = vector.load %arg9[%c1_59, %c0_60, %c0_61] : memref<4x16x16xf32, #tpu.memory_space<vmem>>, vector<1x16x16xf32>
    %183 = vector.shape_cast %182 : vector<1x16x16xf32> to vector<16x16xf32>
    %cst_62 = arith.constant dense<0.000000e+00> : vector<16x256xf32>
    %184 = tpu.matmul %183, %133, %cst_62 {dimension_numbers = #tpu.dot_dimension_numbers<[1], [0], [0], [1], [0, 0, 1, 1], [], []>} : vector<16x16xf32>, vector<16x256xf32>, vector<16x256xf32> -> vector<16x256xf32>
    %c1_63 = arith.constant 1 : index
    %c0_64 = arith.constant 0 : index
    %c0_65 = arith.constant 0 : index
    %185 = vector.load %arg9[%c1_63, %c0_64, %c0_65] : memref<4x16x16xf32, #tpu.memory_space<vmem>>, vector<1x16x16xf32>
    %186 = vector.shape_cast %185 : vector<1x16x16xf32> to vector<16x16xf32>
    %cst_66 = arith.constant dense<0.000000e+00> : vector<16x256xf32>
    %187 = tpu.matmul %186, %143, %cst_66 {dimension_numbers = #tpu.dot_dimension_numbers<[1], [0], [0], [1], [0, 0, 1, 1], [], []>} : vector<16x16xf32>, vector<16x256xf32>, vector<16x256xf32> -> vector<16x256xf32>
    %c2 = arith.constant 2 : index
    %c0_67 = arith.constant 0 : index
    %c0_68 = arith.constant 0 : index
    %188 = vector.load %arg9[%c2, %c0_67, %c0_68] : memref<4x16x16xf32, #tpu.memory_space<vmem>>, vector<1x16x16xf32>
    %189 = vector.shape_cast %188 : vector<1x16x16xf32> to vector<16x16xf32>
    %cst_69 = arith.constant dense<0.000000e+00> : vector<16x256xf32>
    %190 = tpu.matmul %189, %133, %cst_69 {dimension_numbers = #tpu.dot_dimension_numbers<[1], [0], [0], [1], [0, 0, 1, 1], [], []>} : vector<16x16xf32>, vector<16x256xf32>, vector<16x256xf32> -> vector<16x256xf32>
    %c2_70 = arith.constant 2 : index
    %c0_71 = arith.constant 0 : index
    %c0_72 = arith.constant 0 : index
    %191 = vector.load %arg9[%c2_70, %c0_71, %c0_72] : memref<4x16x16xf32, #tpu.memory_space<vmem>>, vector<1x16x16xf32>
    %192 = vector.shape_cast %191 : vector<1x16x16xf32> to vector<16x16xf32>
    %cst_73 = arith.constant dense<0.000000e+00> : vector<16x256xf32>
    %193 = tpu.matmul %192, %143, %cst_73 {dimension_numbers = #tpu.dot_dimension_numbers<[1], [0], [0], [1], [0, 0, 1, 1], [], []>} : vector<16x16xf32>, vector<16x256xf32>, vector<16x256xf32> -> vector<16x256xf32>
    %194 = arith.addf %154, %158 : vector<1x256xf32>
    %195 = arith.addf %194, %162 : vector<1x256xf32>
    %196 = arith.mulf %195, %145 : vector<1x256xf32>
    %197 = arith.addf %172, %196 : vector<1x256xf32>
    %cst_74 = arith.constant 0.707106769 : f32
    %198 = vector.broadcast %cst_74 : f32 to vector<16x1xf32>
    %199 = arith.mulf %198, %181 : vector<16x1xf32>
    %200 = vector.broadcast %150 : vector<1x256xf32> to vector<16x256xf32>
    %201 = vector.broadcast %199 : vector<16x1xf32> to vector<16x256xf32>
    %202 = arith.mulf %200, %201 : vector<16x256xf32>
    %203 = vector.broadcast %197 : vector<1x256xf32> to vector<16x256xf32>
    %204 = arith.addf %203, %202 : vector<16x256xf32>
    %cst_75 = arith.constant 1.000000e+00 : f32
    %205 = vector.broadcast %cst_75 : f32 to vector<16x1xf32>
    %206 = arith.subf %205, %177 : vector<16x1xf32>
    %207 = vector.broadcast %166 : vector<1x256xf32> to vector<16x256xf32>
    %208 = vector.broadcast %206 : vector<16x1xf32> to vector<16x256xf32>
    %209 = arith.mulf %207, %208 : vector<16x256xf32>
    %210 = arith.addf %204, %209 : vector<16x256xf32>
    %cst_76 = arith.constant 0.000000e+00 : f32
    %211 = vector.broadcast %cst_76 : f32 to vector<1x256xf32>
    %212 = arith.subf %211, %146 : vector<1x256xf32>
    %213 = arith.mulf %162, %212 : vector<1x256xf32>
    %214 = vector.broadcast %213 : vector<1x256xf32> to vector<16x256xf32>
    %215 = vector.broadcast %181 : vector<16x1xf32> to vector<16x256xf32>
    %216 = arith.mulf %214, %215 : vector<16x256xf32>
    %cst_77 = arith.constant 0.707106769 : f32
    %217 = vector.broadcast %cst_77 : f32 to vector<1x256xf32>
    %218 = arith.mulf %150, %217 : vector<1x256xf32>
    %cst_78 = arith.constant 0.000000e+00 : f32
    %219 = vector.broadcast %cst_78 : f32 to vector<1x256xf32>
    %220 = arith.subf %219, %146 : vector<1x256xf32>
    %221 = arith.mulf %158, %220 : vector<1x256xf32>
    %222 = vector.broadcast %221 : vector<1x256xf32> to vector<16x256xf32>
    %223 = vector.broadcast %181 : vector<16x1xf32> to vector<16x256xf32>
    %224 = arith.mulf %222, %223 : vector<16x256xf32>
    %225 = vector.broadcast %218 : vector<1x256xf32> to vector<16x256xf32>
    %226 = arith.addf %225, %224 : vector<16x256xf32>
    %cst_79 = arith.constant 0.000000e+00 : f32
    %227 = vector.broadcast %cst_79 : f32 to vector<1x256xf32>
    %228 = arith.subf %227, %146 : vector<1x256xf32>
    %229 = arith.mulf %154, %228 : vector<1x256xf32>
    %230 = vector.broadcast %166 : vector<1x256xf32> to vector<16x256xf32>
    %231 = vector.broadcast %177 : vector<16x1xf32> to vector<16x256xf32>
    %232 = arith.mulf %230, %231 : vector<16x256xf32>
    %233 = arith.mulf %210, %133 : vector<16x256xf32>
    %234 = arith.mulf %216, %143 : vector<16x256xf32>
    %235 = arith.subf %233, %234 : vector<16x256xf32>
    %236 = arith.mulf %226, %184 : vector<16x256xf32>
    %237 = arith.addf %235, %236 : vector<16x256xf32>
    %238 = vector.broadcast %229 : vector<1x256xf32> to vector<16x256xf32>
    %239 = arith.mulf %238, %187 : vector<16x256xf32>
    %240 = arith.subf %237, %239 : vector<16x256xf32>
    %241 = arith.mulf %232, %190 : vector<16x256xf32>
    %242 = arith.addf %240, %241 : vector<16x256xf32>
    %243 = arith.mulf %210, %143 : vector<16x256xf32>
    %244 = arith.mulf %216, %133 : vector<16x256xf32>
    %245 = arith.addf %243, %244 : vector<16x256xf32>
    %246 = arith.mulf %226, %187 : vector<16x256xf32>
    %247 = arith.addf %245, %246 : vector<16x256xf32>
    %248 = vector.broadcast %229 : vector<1x256xf32> to vector<16x256xf32>
    %249 = arith.mulf %248, %184 : vector<16x256xf32>
    %250 = arith.addf %247, %249 : vector<16x256xf32>
    %251 = arith.mulf %232, %193 : vector<16x256xf32>
    %252 = arith.addf %250, %251 : vector<16x256xf32>
    %253 = vector.extract_strided_slice %1 {offsets = [2, 0], sizes = [1, 256], strides = [1, 1]} : vector<4x256xi32> to vector<1x256xi32>
    %254 = vector.extract_strided_slice %23 {offsets = [2, 0], sizes = [1, 256], strides = [1, 1]} : vector<4x256xf32> to vector<1x256xf32>
    %255 = vector.extract_strided_slice %26 {offsets = [2, 0], sizes = [1, 256], strides = [1, 1]} : vector<4x256xf32> to vector<1x256xf32>
    %c0_i32_80 = arith.constant 0 : i32
    %256 = vector.broadcast %c0_i32_80 : i32 to vector<1x256xi32>
    %257 = arith.cmpi eq, %253, %256 : vector<1x256xi32>
    %258 = arith.extui %257 : vector<1x256xi1> to vector<1x256xi32>
    %259 = arith.sitofp %258 : vector<1x256xi32> to vector<1x256xf32>
    %c1_i32_81 = arith.constant 1 : i32
    %260 = vector.broadcast %c1_i32_81 : i32 to vector<1x256xi32>
    %261 = arith.cmpi eq, %253, %260 : vector<1x256xi32>
    %262 = arith.extui %261 : vector<1x256xi1> to vector<1x256xi32>
    %263 = arith.sitofp %262 : vector<1x256xi32> to vector<1x256xf32>
    %c2_i32_82 = arith.constant 2 : i32
    %264 = vector.broadcast %c2_i32_82 : i32 to vector<1x256xi32>
    %265 = arith.cmpi eq, %253, %264 : vector<1x256xi32>
    %266 = arith.extui %265 : vector<1x256xi1> to vector<1x256xi32>
    %267 = arith.sitofp %266 : vector<1x256xi32> to vector<1x256xf32>
    %c3_i32_83 = arith.constant 3 : i32
    %268 = vector.broadcast %c3_i32_83 : i32 to vector<1x256xi32>
    %269 = arith.cmpi eq, %253, %268 : vector<1x256xi32>
    %270 = arith.extui %269 : vector<1x256xi1> to vector<1x256xi32>
    %271 = arith.sitofp %270 : vector<1x256xi32> to vector<1x256xf32>
    %c4_i32_84 = arith.constant 4 : i32
    %272 = vector.broadcast %c4_i32_84 : i32 to vector<1x256xi32>
    %273 = arith.cmpi eq, %253, %272 : vector<1x256xi32>
    %274 = arith.extui %273 : vector<1x256xi1> to vector<1x256xi32>
    %275 = arith.sitofp %274 : vector<1x256xi32> to vector<1x256xf32>
    %276 = arith.addf %259, %263 : vector<1x256xf32>
    %277 = arith.addf %276, %267 : vector<1x256xf32>
    %278 = arith.addf %277, %271 : vector<1x256xf32>
    %279 = arith.addf %278, %275 : vector<1x256xf32>
    %cst_85 = arith.constant 1.000000e+00 : f32
    %280 = vector.broadcast %cst_85 : f32 to vector<1x256xf32>
    %281 = arith.subf %280, %279 : vector<1x256xf32>
    %c1_i32_86 = arith.constant 1 : i32
    %282 = vector.broadcast %c1_i32_86 : i32 to vector<16x1xi32>
    %283 = arith.shrsi %27, %282 : vector<16x1xi32>
    %c1_i32_87 = arith.constant 1 : i32
    %284 = vector.broadcast %c1_i32_87 : i32 to vector<16x1xi32>
    %285 = arith.andi %283, %284 : vector<16x1xi32>
    %286 = arith.sitofp %285 : vector<16x1xi32> to vector<16x1xf32>
    %cst_88 = arith.constant 2.000000e+00 : f32
    %287 = vector.broadcast %cst_88 : f32 to vector<16x1xf32>
    %288 = arith.mulf %287, %286 : vector<16x1xf32>
    %cst_89 = arith.constant 1.000000e+00 : f32
    %289 = vector.broadcast %cst_89 : f32 to vector<16x1xf32>
    %290 = arith.subf %289, %288 : vector<16x1xf32>
    %c2_90 = arith.constant 2 : index
    %c0_91 = arith.constant 0 : index
    %c0_92 = arith.constant 0 : index
    %291 = vector.load %arg9[%c2_90, %c0_91, %c0_92] : memref<4x16x16xf32, #tpu.memory_space<vmem>>, vector<1x16x16xf32>
    %292 = vector.shape_cast %291 : vector<1x16x16xf32> to vector<16x16xf32>
    %cst_93 = arith.constant dense<0.000000e+00> : vector<16x256xf32>
    %293 = tpu.matmul %292, %242, %cst_93 {dimension_numbers = #tpu.dot_dimension_numbers<[1], [0], [0], [1], [0, 0, 1, 1], [], []>} : vector<16x16xf32>, vector<16x256xf32>, vector<16x256xf32> -> vector<16x256xf32>
    %c2_94 = arith.constant 2 : index
    %c0_95 = arith.constant 0 : index
    %c0_96 = arith.constant 0 : index
    %294 = vector.load %arg9[%c2_94, %c0_95, %c0_96] : memref<4x16x16xf32, #tpu.memory_space<vmem>>, vector<1x16x16xf32>
    %295 = vector.shape_cast %294 : vector<1x16x16xf32> to vector<16x16xf32>
    %cst_97 = arith.constant dense<0.000000e+00> : vector<16x256xf32>
    %296 = tpu.matmul %295, %252, %cst_97 {dimension_numbers = #tpu.dot_dimension_numbers<[1], [0], [0], [1], [0, 0, 1, 1], [], []>} : vector<16x16xf32>, vector<16x256xf32>, vector<16x256xf32> -> vector<16x256xf32>
    %c3 = arith.constant 3 : index
    %c0_98 = arith.constant 0 : index
    %c0_99 = arith.constant 0 : index
    %297 = vector.load %arg9[%c3, %c0_98, %c0_99] : memref<4x16x16xf32, #tpu.memory_space<vmem>>, vector<1x16x16xf32>
    %298 = vector.shape_cast %297 : vector<1x16x16xf32> to vector<16x16xf32>
    %cst_100 = arith.constant dense<0.000000e+00> : vector<16x256xf32>
    %299 = tpu.matmul %298, %242, %cst_100 {dimension_numbers = #tpu.dot_dimension_numbers<[1], [0], [0], [1], [0, 0, 1, 1], [], []>} : vector<16x16xf32>, vector<16x256xf32>, vector<16x256xf32> -> vector<16x256xf32>
    %c3_101 = arith.constant 3 : index
    %c0_102 = arith.constant 0 : index
    %c0_103 = arith.constant 0 : index
    %300 = vector.load %arg9[%c3_101, %c0_102, %c0_103] : memref<4x16x16xf32, #tpu.memory_space<vmem>>, vector<1x16x16xf32>
    %301 = vector.shape_cast %300 : vector<1x16x16xf32> to vector<16x16xf32>
    %cst_104 = arith.constant dense<0.000000e+00> : vector<16x256xf32>
    %302 = tpu.matmul %301, %252, %cst_104 {dimension_numbers = #tpu.dot_dimension_numbers<[1], [0], [0], [1], [0, 0, 1, 1], [], []>} : vector<16x16xf32>, vector<16x256xf32>, vector<16x256xf32> -> vector<16x256xf32>
    %303 = arith.addf %263, %267 : vector<1x256xf32>
    %304 = arith.addf %303, %271 : vector<1x256xf32>
    %305 = arith.mulf %304, %254 : vector<1x256xf32>
    %306 = arith.addf %281, %305 : vector<1x256xf32>
    %cst_105 = arith.constant 0.707106769 : f32
    %307 = vector.broadcast %cst_105 : f32 to vector<16x1xf32>
    %308 = arith.mulf %307, %290 : vector<16x1xf32>
    %309 = vector.broadcast %259 : vector<1x256xf32> to vector<16x256xf32>
    %310 = vector.broadcast %308 : vector<16x1xf32> to vector<16x256xf32>
    %311 = arith.mulf %309, %310 : vector<16x256xf32>
    %312 = vector.broadcast %306 : vector<1x256xf32> to vector<16x256xf32>
    %313 = arith.addf %312, %311 : vector<16x256xf32>
    %cst_106 = arith.constant 1.000000e+00 : f32
    %314 = vector.broadcast %cst_106 : f32 to vector<16x1xf32>
    %315 = arith.subf %314, %286 : vector<16x1xf32>
    %316 = vector.broadcast %275 : vector<1x256xf32> to vector<16x256xf32>
    %317 = vector.broadcast %315 : vector<16x1xf32> to vector<16x256xf32>
    %318 = arith.mulf %316, %317 : vector<16x256xf32>
    %319 = arith.addf %313, %318 : vector<16x256xf32>
    %cst_107 = arith.constant 0.000000e+00 : f32
    %320 = vector.broadcast %cst_107 : f32 to vector<1x256xf32>
    %321 = arith.subf %320, %255 : vector<1x256xf32>
    %322 = arith.mulf %271, %321 : vector<1x256xf32>
    %323 = vector.broadcast %322 : vector<1x256xf32> to vector<16x256xf32>
    %324 = vector.broadcast %290 : vector<16x1xf32> to vector<16x256xf32>
    %325 = arith.mulf %323, %324 : vector<16x256xf32>
    %cst_108 = arith.constant 0.707106769 : f32
    %326 = vector.broadcast %cst_108 : f32 to vector<1x256xf32>
    %327 = arith.mulf %259, %326 : vector<1x256xf32>
    %cst_109 = arith.constant 0.000000e+00 : f32
    %328 = vector.broadcast %cst_109 : f32 to vector<1x256xf32>
    %329 = arith.subf %328, %255 : vector<1x256xf32>
    %330 = arith.mulf %267, %329 : vector<1x256xf32>
    %331 = vector.broadcast %330 : vector<1x256xf32> to vector<16x256xf32>
    %332 = vector.broadcast %290 : vector<16x1xf32> to vector<16x256xf32>
    %333 = arith.mulf %331, %332 : vector<16x256xf32>
    %334 = vector.broadcast %327 : vector<1x256xf32> to vector<16x256xf32>
    %335 = arith.addf %334, %333 : vector<16x256xf32>
    %cst_110 = arith.constant 0.000000e+00 : f32
    %336 = vector.broadcast %cst_110 : f32 to vector<1x256xf32>
    %337 = arith.subf %336, %255 : vector<1x256xf32>
    %338 = arith.mulf %263, %337 : vector<1x256xf32>
    %339 = vector.broadcast %275 : vector<1x256xf32> to vector<16x256xf32>
    %340 = vector.broadcast %286 : vector<16x1xf32> to vector<16x256xf32>
    %341 = arith.mulf %339, %340 : vector<16x256xf32>
    %342 = arith.mulf %319, %242 : vector<16x256xf32>
    %343 = arith.mulf %325, %252 : vector<16x256xf32>
    %344 = arith.subf %342, %343 : vector<16x256xf32>
    %345 = arith.mulf %335, %293 : vector<16x256xf32>
    %346 = arith.addf %344, %345 : vector<16x256xf32>
    %347 = vector.broadcast %338 : vector<1x256xf32> to vector<16x256xf32>
    %348 = arith.mulf %347, %296 : vector<16x256xf32>
    %349 = arith.subf %346, %348 : vector<16x256xf32>
    %350 = arith.mulf %341, %299 : vector<16x256xf32>
    %351 = arith.addf %349, %350 : vector<16x256xf32>
    %352 = arith.mulf %319, %252 : vector<16x256xf32>
    %353 = arith.mulf %325, %242 : vector<16x256xf32>
    %354 = arith.addf %352, %353 : vector<16x256xf32>
    %355 = arith.mulf %335, %296 : vector<16x256xf32>
    %356 = arith.addf %354, %355 : vector<16x256xf32>
    %357 = vector.broadcast %338 : vector<1x256xf32> to vector<16x256xf32>
    %358 = arith.mulf %357, %293 : vector<16x256xf32>
    %359 = arith.addf %356, %358 : vector<16x256xf32>
    %360 = arith.mulf %341, %302 : vector<16x256xf32>
    %361 = arith.addf %359, %360 : vector<16x256xf32>
    %362 = vector.extract_strided_slice %1 {offsets = [3, 0], sizes = [1, 256], strides = [1, 1]} : vector<4x256xi32> to vector<1x256xi32>
    %363 = vector.extract_strided_slice %23 {offsets = [3, 0], sizes = [1, 256], strides = [1, 1]} : vector<4x256xf32> to vector<1x256xf32>
    %364 = vector.extract_strided_slice %26 {offsets = [3, 0], sizes = [1, 256], strides = [1, 1]} : vector<4x256xf32> to vector<1x256xf32>
    %c0_i32_111 = arith.constant 0 : i32
    %365 = vector.broadcast %c0_i32_111 : i32 to vector<1x256xi32>
    %366 = arith.cmpi eq, %362, %365 : vector<1x256xi32>
    %367 = arith.extui %366 : vector<1x256xi1> to vector<1x256xi32>
    %368 = arith.sitofp %367 : vector<1x256xi32> to vector<1x256xf32>
    %c1_i32_112 = arith.constant 1 : i32
    %369 = vector.broadcast %c1_i32_112 : i32 to vector<1x256xi32>
    %370 = arith.cmpi eq, %362, %369 : vector<1x256xi32>
    %371 = arith.extui %370 : vector<1x256xi1> to vector<1x256xi32>
    %372 = arith.sitofp %371 : vector<1x256xi32> to vector<1x256xf32>
    %c2_i32_113 = arith.constant 2 : i32
    %373 = vector.broadcast %c2_i32_113 : i32 to vector<1x256xi32>
    %374 = arith.cmpi eq, %362, %373 : vector<1x256xi32>
    %375 = arith.extui %374 : vector<1x256xi1> to vector<1x256xi32>
    %376 = arith.sitofp %375 : vector<1x256xi32> to vector<1x256xf32>
    %c3_i32_114 = arith.constant 3 : i32
    %377 = vector.broadcast %c3_i32_114 : i32 to vector<1x256xi32>
    %378 = arith.cmpi eq, %362, %377 : vector<1x256xi32>
    %379 = arith.extui %378 : vector<1x256xi1> to vector<1x256xi32>
    %380 = arith.sitofp %379 : vector<1x256xi32> to vector<1x256xf32>
    %c4_i32_115 = arith.constant 4 : i32
    %381 = vector.broadcast %c4_i32_115 : i32 to vector<1x256xi32>
    %382 = arith.cmpi eq, %362, %381 : vector<1x256xi32>
    %383 = arith.extui %382 : vector<1x256xi1> to vector<1x256xi32>
    %384 = arith.sitofp %383 : vector<1x256xi32> to vector<1x256xf32>
    %385 = arith.addf %368, %372 : vector<1x256xf32>
    %386 = arith.addf %385, %376 : vector<1x256xf32>
    %387 = arith.addf %386, %380 : vector<1x256xf32>
    %388 = arith.addf %387, %384 : vector<1x256xf32>
    %cst_116 = arith.constant 1.000000e+00 : f32
    %389 = vector.broadcast %cst_116 : f32 to vector<1x256xf32>
    %390 = arith.subf %389, %388 : vector<1x256xf32>
    %c0_i32_117 = arith.constant 0 : i32
    %391 = vector.broadcast %c0_i32_117 : i32 to vector<16x1xi32>
    %392 = arith.shrsi %27, %391 : vector<16x1xi32>
    %c1_i32_118 = arith.constant 1 : i32
    %393 = vector.broadcast %c1_i32_118 : i32 to vector<16x1xi32>
    %394 = arith.andi %392, %393 : vector<16x1xi32>
    %395 = arith.sitofp %394 : vector<16x1xi32> to vector<16x1xf32>
    %cst_119 = arith.constant 2.000000e+00 : f32
    %396 = vector.broadcast %cst_119 : f32 to vector<16x1xf32>
    %397 = arith.mulf %396, %395 : vector<16x1xf32>
    %cst_120 = arith.constant 1.000000e+00 : f32
    %398 = vector.broadcast %cst_120 : f32 to vector<16x1xf32>
    %399 = arith.subf %398, %397 : vector<16x1xf32>
    %c3_121 = arith.constant 3 : index
    %c0_122 = arith.constant 0 : index
    %c0_123 = arith.constant 0 : index
    %400 = vector.load %arg9[%c3_121, %c0_122, %c0_123] : memref<4x16x16xf32, #tpu.memory_space<vmem>>, vector<1x16x16xf32>
    %401 = vector.shape_cast %400 : vector<1x16x16xf32> to vector<16x16xf32>
    %cst_124 = arith.constant dense<0.000000e+00> : vector<16x256xf32>
    %402 = tpu.matmul %401, %351, %cst_124 {dimension_numbers = #tpu.dot_dimension_numbers<[1], [0], [0], [1], [0, 0, 1, 1], [], []>} : vector<16x16xf32>, vector<16x256xf32>, vector<16x256xf32> -> vector<16x256xf32>
    %c3_125 = arith.constant 3 : index
    %c0_126 = arith.constant 0 : index
    %c0_127 = arith.constant 0 : index
    %403 = vector.load %arg9[%c3_125, %c0_126, %c0_127] : memref<4x16x16xf32, #tpu.memory_space<vmem>>, vector<1x16x16xf32>
    %404 = vector.shape_cast %403 : vector<1x16x16xf32> to vector<16x16xf32>
    %cst_128 = arith.constant dense<0.000000e+00> : vector<16x256xf32>
    %405 = tpu.matmul %404, %361, %cst_128 {dimension_numbers = #tpu.dot_dimension_numbers<[1], [0], [0], [1], [0, 0, 1, 1], [], []>} : vector<16x16xf32>, vector<16x256xf32>, vector<16x256xf32> -> vector<16x256xf32>
    %c0_129 = arith.constant 0 : index
    %c0_130 = arith.constant 0 : index
    %c0_131 = arith.constant 0 : index
    %406 = vector.load %arg9[%c0_129, %c0_130, %c0_131] : memref<4x16x16xf32, #tpu.memory_space<vmem>>, vector<1x16x16xf32>
    %407 = vector.shape_cast %406 : vector<1x16x16xf32> to vector<16x16xf32>
    %cst_132 = arith.constant dense<0.000000e+00> : vector<16x256xf32>
    %408 = tpu.matmul %407, %351, %cst_132 {dimension_numbers = #tpu.dot_dimension_numbers<[1], [0], [0], [1], [0, 0, 1, 1], [], []>} : vector<16x16xf32>, vector<16x256xf32>, vector<16x256xf32> -> vector<16x256xf32>
    %c0_133 = arith.constant 0 : index
    %c0_134 = arith.constant 0 : index
    %c0_135 = arith.constant 0 : index
    %409 = vector.load %arg9[%c0_133, %c0_134, %c0_135] : memref<4x16x16xf32, #tpu.memory_space<vmem>>, vector<1x16x16xf32>
    %410 = vector.shape_cast %409 : vector<1x16x16xf32> to vector<16x16xf32>
    %cst_136 = arith.constant dense<0.000000e+00> : vector<16x256xf32>
    %411 = tpu.matmul %410, %361, %cst_136 {dimension_numbers = #tpu.dot_dimension_numbers<[1], [0], [0], [1], [0, 0, 1, 1], [], []>} : vector<16x16xf32>, vector<16x256xf32>, vector<16x256xf32> -> vector<16x256xf32>
    %412 = arith.addf %372, %376 : vector<1x256xf32>
    %413 = arith.addf %412, %380 : vector<1x256xf32>
    %414 = arith.mulf %413, %363 : vector<1x256xf32>
    %415 = arith.addf %390, %414 : vector<1x256xf32>
    %cst_137 = arith.constant 0.707106769 : f32
    %416 = vector.broadcast %cst_137 : f32 to vector<16x1xf32>
    %417 = arith.mulf %416, %399 : vector<16x1xf32>
    %418 = vector.broadcast %368 : vector<1x256xf32> to vector<16x256xf32>
    %419 = vector.broadcast %417 : vector<16x1xf32> to vector<16x256xf32>
    %420 = arith.mulf %418, %419 : vector<16x256xf32>
    %421 = vector.broadcast %415 : vector<1x256xf32> to vector<16x256xf32>
    %422 = arith.addf %421, %420 : vector<16x256xf32>
    %cst_138 = arith.constant 1.000000e+00 : f32
    %423 = vector.broadcast %cst_138 : f32 to vector<16x1xf32>
    %424 = arith.subf %423, %395 : vector<16x1xf32>
    %425 = vector.broadcast %384 : vector<1x256xf32> to vector<16x256xf32>
    %426 = vector.broadcast %424 : vector<16x1xf32> to vector<16x256xf32>
    %427 = arith.mulf %425, %426 : vector<16x256xf32>
    %428 = arith.addf %422, %427 : vector<16x256xf32>
    %cst_139 = arith.constant 0.000000e+00 : f32
    %429 = vector.broadcast %cst_139 : f32 to vector<1x256xf32>
    %430 = arith.subf %429, %364 : vector<1x256xf32>
    %431 = arith.mulf %380, %430 : vector<1x256xf32>
    %432 = vector.broadcast %431 : vector<1x256xf32> to vector<16x256xf32>
    %433 = vector.broadcast %399 : vector<16x1xf32> to vector<16x256xf32>
    %434 = arith.mulf %432, %433 : vector<16x256xf32>
    %cst_140 = arith.constant 0.707106769 : f32
    %435 = vector.broadcast %cst_140 : f32 to vector<1x256xf32>
    %436 = arith.mulf %368, %435 : vector<1x256xf32>
    %cst_141 = arith.constant 0.000000e+00 : f32
    %437 = vector.broadcast %cst_141 : f32 to vector<1x256xf32>
    %438 = arith.subf %437, %364 : vector<1x256xf32>
    %439 = arith.mulf %376, %438 : vector<1x256xf32>
    %440 = vector.broadcast %439 : vector<1x256xf32> to vector<16x256xf32>
    %441 = vector.broadcast %399 : vector<16x1xf32> to vector<16x256xf32>
    %442 = arith.mulf %440, %441 : vector<16x256xf32>
    %443 = vector.broadcast %436 : vector<1x256xf32> to vector<16x256xf32>
    %444 = arith.addf %443, %442 : vector<16x256xf32>
    %cst_142 = arith.constant 0.000000e+00 : f32
    %445 = vector.broadcast %cst_142 : f32 to vector<1x256xf32>
    %446 = arith.subf %445, %364 : vector<1x256xf32>
    %447 = arith.mulf %372, %446 : vector<1x256xf32>
    %448 = vector.broadcast %384 : vector<1x256xf32> to vector<16x256xf32>
    %449 = vector.broadcast %395 : vector<16x1xf32> to vector<16x256xf32>
    %450 = arith.mulf %448, %449 : vector<16x256xf32>
    %451 = arith.mulf %428, %351 : vector<16x256xf32>
    %452 = arith.mulf %434, %361 : vector<16x256xf32>
    %453 = arith.subf %451, %452 : vector<16x256xf32>
    %454 = arith.mulf %444, %402 : vector<16x256xf32>
    %455 = arith.addf %453, %454 : vector<16x256xf32>
    %456 = vector.broadcast %447 : vector<1x256xf32> to vector<16x256xf32>
    %457 = arith.mulf %456, %405 : vector<16x256xf32>
    %458 = arith.subf %455, %457 : vector<16x256xf32>
    %459 = arith.mulf %450, %408 : vector<16x256xf32>
    %460 = arith.addf %458, %459 : vector<16x256xf32>
    %461 = arith.mulf %428, %361 : vector<16x256xf32>
    %462 = arith.mulf %434, %351 : vector<16x256xf32>
    %463 = arith.addf %461, %462 : vector<16x256xf32>
    %464 = arith.mulf %444, %405 : vector<16x256xf32>
    %465 = arith.addf %463, %464 : vector<16x256xf32>
    %466 = vector.broadcast %447 : vector<1x256xf32> to vector<16x256xf32>
    %467 = arith.mulf %466, %402 : vector<16x256xf32>
    %468 = arith.addf %465, %467 : vector<16x256xf32>
    %469 = arith.mulf %450, %411 : vector<16x256xf32>
    %470 = arith.addf %468, %469 : vector<16x256xf32>
    %471 = vector.extract_strided_slice %460 {offsets = [0, 0], sizes = [16, 128], strides = [1, 1]} : vector<16x256xf32> to vector<16x128xf32>
    %472 = vector.extract_strided_slice %460 {offsets = [0, 128], sizes = [16, 128], strides = [1, 1]} : vector<16x256xf32> to vector<16x128xf32>
    %473 = vector.extract_strided_slice %470 {offsets = [0, 0], sizes = [16, 128], strides = [1, 1]} : vector<16x256xf32> to vector<16x128xf32>
    %474 = vector.extract_strided_slice %470 {offsets = [0, 128], sizes = [16, 128], strides = [1, 1]} : vector<16x256xf32> to vector<16x128xf32>
    %475 = arith.mulf %472, %471 : vector<16x128xf32>
    %476 = arith.mulf %474, %473 : vector<16x128xf32>
    %477 = arith.addf %475, %476 : vector<16x128xf32>
    %cst_143 = arith.constant dense<0.000000e+00> : vector<128xf32>
    %478 = vector.multi_reduction <add>, %477, %cst_143 [0] : vector<16x128xf32> to vector<128xf32>
    %479 = vector.shape_cast %478 : vector<128xf32> to vector<1x128xf32>
    %480 = arith.mulf %472, %473 : vector<16x128xf32>
    %481 = arith.mulf %474, %471 : vector<16x128xf32>
    %482 = arith.subf %480, %481 : vector<16x128xf32>
    %cst_144 = arith.constant dense<0.000000e+00> : vector<128xf32>
    %483 = vector.multi_reduction <add>, %482, %cst_144 [0] : vector<16x128xf32> to vector<128xf32>
    %484 = vector.shape_cast %483 : vector<128xf32> to vector<1x128xf32>
    %485 = arith.mulf %479, %479 : vector<1x128xf32>
    %486 = arith.mulf %484, %484 : vector<1x128xf32>
    %487 = arith.addf %485, %486 : vector<1x128xf32>
    %c0_145 = arith.constant 0 : index
    %c0_146 = arith.constant 0 : index
    %488 = vector.load %arg10[%c0_145, %c0_146] : memref<1x128xf32, #tpu.memory_space<vmem>>, vector<1x128xf32>
    tpu.vector_store %arg10[%c0_145, %c0_146], %487 {strides = array<i32>} : memref<1x128xf32, #tpu.memory_space<vmem>>, vector<1x128xf32>,
    return
  }
  func.func @transform_0(%arg0: i32) -> (i32, i32) {
    %c0_i32 = arith.constant 0 : i32
    %c0_i32_0 = arith.constant 0 : i32
    return %c0_i32, %arg0 : i32, i32
  }
  func.func @transform_1(%arg0: i32) -> (i32, i32) {
    %c0_i32 = arith.constant 0 : i32
    %c0_i32_0 = arith.constant 0 : i32
    return %c0_i32, %arg0 : i32, i32
  }
  func.func @transform_2(%arg0: i32) -> (i32, i32) {
    %c0_i32 = arith.constant 0 : i32
    %c0_i32_0 = arith.constant 0 : i32
    %c0_i32_1 = arith.constant 0 : i32
    return %c0_i32, %c0_i32_0 : i32, i32
  }
  func.func @transform_3(%arg0: i32) -> (i32, i32) {
    %c0_i32 = arith.constant 0 : i32
    %c0_i32_0 = arith.constant 0 : i32
    %c0_i32_1 = arith.constant 0 : i32
    return %c0_i32, %c0_i32_0 : i32, i32
  }
  func.func @transform_4(%arg0: i32) -> (i32, i32) {
    %c0_i32 = arith.constant 0 : i32
    %c0_i32_0 = arith.constant 0 : i32
    %c0_i32_1 = arith.constant 0 : i32
    return %c0_i32, %c0_i32_0 : i32, i32
  }
  func.func @transform_5(%arg0: i32) -> (i32, i32) {
    %c0_i32 = arith.constant 0 : i32
    %c0_i32_0 = arith.constant 0 : i32
    %c0_i32_1 = arith.constant 0 : i32
    return %c0_i32, %c0_i32_0 : i32, i32
  }
  func.func @transform_6(%arg0: i32) -> (i32, i32) {
    %c0_i32 = arith.constant 0 : i32
    %c0_i32_0 = arith.constant 0 : i32
    %c0_i32_1 = arith.constant 0 : i32
    return %c0_i32, %c0_i32_0 : i32, i32
  }
  func.func @transform_7(%arg0: i32) -> (i32, i32) {
    %c0_i32 = arith.constant 0 : i32
    %c0_i32_0 = arith.constant 0 : i32
    %c0_i32_1 = arith.constant 0 : i32
    return %c0_i32, %c0_i32_0 : i32, i32
  }
  func.func @transform_8(%arg0: i32) -> (i32, i32, i32) {
    %c0_i32 = arith.constant 0 : i32
    %c0_i32_0 = arith.constant 0 : i32
    %c0_i32_1 = arith.constant 0 : i32
    %c0_i32_2 = arith.constant 0 : i32
    return %c0_i32, %c0_i32_0, %c0_i32_1 : i32, i32, i32
  }
  func.func @transform_9(%arg0: i32) -> (i32, i32) {
    %c0_i32 = arith.constant 0 : i32
    %c0_i32_0 = arith.constant 0 : i32
    return %c0_i32, %arg0 : i32, i32
  }
}

</mosaic_0001>

<bundles_post_ra>
// kernel: tpu_custom_call.1
= control target key start
LH: loop header
LB: loop body
LE: loop exit
PB: predicated region body
PF: predicated region fallthrough
CT: control target
= control target key end

     0   :  { %14 = vsyncpa [#allocation3], 0  ;;  %s4491_s0 = inlined_call_operand.hbm [shape: f32[4,256], index: 0, kind: input, shape index: {}]   ;;  %s4492_s1 = inlined_call_operand.hbm [shape: s32[4,256], index: 1, kind: input, shape index: {}]   ;;  %s4493_s2 = inlined_call_operand.vmem [shape: f32[8,4], index: 2, kind: input, shape index: {}]   ;;  %s4494_s3 = inlined_call_operand.vmem [shape: f32[8,1], index: 3, kind: input, shape index: {}]   ;;  %s4495_s4 = inlined_call_operand.hbm [shape: f32[8,8], index: 4, kind: input, shape index: {}]   ;;  %s4496_s5 = inlined_call_operand.vmem [shape: f32[8,1], index: 5, kind: input, shape index: {}]   ;;  %s4497_s6 = inlined_call_operand.hbm [shape: f32[4,8], index: 6, kind: input, shape index: {}]   ;;  %s4498_s7 = inlined_call_operand.vmem [shape: f32[4,1], index: 7, kind: input, shape index: {}]   ;;  %s4499_s8 = inlined_call_operand.vmem [shape: f32[4,16,16], index: 8, kind: input, shape index: {}]   ;;  %s4500_s9 = inlined_call_operand.hbm [shape: f32[1,128], index: 9, kind: output, shape index: {}]  }
   0x1   :  { %15 = vsyncpa [#allocation6], 0 }
   0x2   :  { %16 = vsyncpa [#allocation9], 0 }
   0x3   :  { %17 = vsyncpa [#allocation4], 0  ;;  %s3385_s30 = smov [#allocation5]   ;;  %s3386_s11 = smov [#allocation2]  }
   0x4   :  { %s34_s10 = sshll.u32 %s3385_s30, 4  ;;  %s24_s12 = sshll.u32 %s3386_s11, 4  ;;  %s35_s10 = int_to_ptr.vmem [resolvable:$true] %s34_s10  ;;  %s25_s12 = int_to_ptr.vmem [resolvable:$true] %s24_s12 }
   0x5   :  { %s3267_s15 = scalar_lea.hbm %s4492_s1, 128 }
   0x6   :  { %p3268_p0 = scmp.ne.s32.totalorder %s4492_s1, %s3267_s15  ;;  %p3271_p1 = scmp.lt.u32.totalorder %s3267_s15, %s4492_s1 }
   0x8   :  { %p3273_p2 = pnand %p3271_p1, %p3268_p0 }
   0xa   :  { %3276 = shalt.err (!%p3273_p2)
}
   0xb   :  { %s3277_s20 = scalar_lea.vmem %s35_s10, 128  ;;  %p3282_p4 = scmp.lt.s32.totalorder %s35_s10, %s35_s10 }
   0xc   :  { %p3278_p3 = scmp.ne.s32.totalorder %s35_s10, %s3277_s20  ;;  %p3283_p5 = scmp.lt.s32.totalorder %s3277_s20, %s3277_s20 }
   0xe   :  { %p3284_p6 = por %p3283_p5, %p3282_p4 }
  0x10   :  { %p3285_p7 = pnand %p3284_p6, %p3278_p3 }
  0x12   :  { %3288 = shalt.err (!%p3285_p7)
}
  0x13   :  { %37 = dma.hbm_to_vmem [thread:$0]  %s4492_s1, 128, %s35_s10, [#allocation6]  }
  0x14   :  { %s3289_s25 = scalar_lea.hbm %s4491_s0, 128 }
  0x15   :  { %p3290_p8 = scmp.ne.s32.totalorder %s4491_s0, %s3289_s25  ;;  %p3293_p9 = scmp.lt.u32.totalorder %s3289_s25, %s4491_s0 }
  0x17   :  { %p3295_p10 = pnand %p3293_p9, %p3290_p8 }
  0x19   :  { %3298 = shalt.err (!%p3295_p10)
}
  0x1a   :  { %s3299_s30 = scalar_lea.vmem %s25_s12, 128  ;;  %p3304_p12 = scmp.lt.s32.totalorder %s25_s12, %s25_s12 }
  0x1b   :  { %p3300_p11 = scmp.ne.s32.totalorder %s25_s12, %s3299_s30  ;;  %p3305_p13 = scmp.lt.s32.totalorder %s3299_s30, %s3299_s30 }
  0x1d   :  { %p3306_p0 = por %p3305_p13, %p3304_p12 }
  0x1f   :  { %p3307_p1 = pnand %p3306_p0, %p3300_p11 }
  0x21   :  { %3310 = shalt.err (!%p3307_p1)
}
  0x22   :  { %27 = dma.hbm_to_vmem [thread:$0]  %s4491_s0, 128, %s25_s12, [#allocation3]  }
  0x23   :  { %s3387_s11 = smov [#allocation7]   ;;  %s3388_s14 = smov [#allocation8]  }
  0x24   :  { %s48_s13 = sshll.u32 %s3387_s11, 4  ;;  %s60_s15 = sshll.u32 %s3388_s14, 4  ;;  %s49_s13 = int_to_ptr.vmem [resolvable:$true] %s48_s13  ;;  %s61_s15 = int_to_ptr.vmem [resolvable:$true] %s60_s15 }
  0x25   :  { %s3311_s18 = scalar_lea.hbm %s4495_s4, 128 }
  0x26   :  { %p3312_p2 = scmp.ne.s32.totalorder %s4495_s4, %s3311_s18  ;;  %p3315_p3 = scmp.lt.u32.totalorder %s3311_s18, %s4495_s4 }
  0x28   :  { %p3317_p4 = pnand %p3315_p3, %p3312_p2 }
  0x2a   :  { %3320 = shalt.err (!%p3317_p4)
}
  0x2b   :  { %s3321_s0 = scalar_lea.vmem %s49_s13, 128  ;;  %p3326_p6 = scmp.lt.s32.totalorder %s49_s13, %s49_s13 }
  0x2c   :  { %p3322_p5 = scmp.ne.s32.totalorder %s49_s13, %s3321_s0  ;;  %p3327_p7 = scmp.lt.s32.totalorder %s3321_s0, %s3321_s0 }
  0x2e   :  { %p3328_p8 = por %p3327_p7, %p3326_p6 }
  0x30   :  { %p3329_p9 = pnand %p3328_p8, %p3322_p5 }
  0x32   :  { %3332 = shalt.err (!%p3329_p9)
}
  0x33   :  { %51 = dma.hbm_to_vmem [thread:$0]  %s4495_s4, 128, %s49_s13, [#allocation6]  }
  0x34   :  { %s3333_s26 = scalar_lea.hbm %s4497_s6, 64 }
  0x35   :  { %p3334_p10 = scmp.ne.s32.totalorder %s4497_s6, %s3333_s26  ;;  %p3337_p11 = scmp.lt.u32.totalorder %s3333_s26, %s4497_s6 }
  0x37   :  { %p3339_p12 = pnand %p3337_p11, %p3334_p10 }
  0x39   :  { %3342 = shalt.err (!%p3339_p12)
}
  0x3a   :  { %s3343_s1 = scalar_lea.vmem %s61_s15, 64  ;;  %p3348_p0 = scmp.lt.s32.totalorder %s61_s15, %s61_s15 }
  0x3b   :  { %p3344_p13 = scmp.ne.s32.totalorder %s61_s15, %s3343_s1  ;;  %p3349_p1 = scmp.lt.s32.totalorder %s3343_s1, %s3343_s1 }
  0x3d   :  { %p3350_p2 = por %p3349_p1, %p3348_p0 }
  0x3f   :  { %p3351_p3 = pnand %p3350_p2, %p3344_p13 }
  0x41   :  { %3354 = shalt.err (!%p3351_p3)
}
  0x42   :  { %63 = dma.hbm_to_vmem [thread:$0]  %s4497_s6, 64, %s61_s15, [#allocation9]  }
  0x43   :  { %3377 = dma.done.wait [#allocation3], 128  }
  0x44   :  { %3378 = vsyncadd [#allocation3], 4294967168 }
  0x45   :  { %3379 = dma.done.wait [#allocation6], 256  }
  0x46   :  { %3380 = vsyncadd [#allocation6], 4294967040 }
  0x47   :  { %3381 = dma.done.wait [#allocation9], 64  }
  0x48   :  { %3382 = vsyncadd [#allocation9], 4294967232  ;;  %v4501_v0 = vmov 0.0   ;;  %v3390_v1 = vmov 0   ;;  %v80_v2 = vld [vmem:[#allocation2] sm:$0xff]  ;;  %vm95_vm0 = vcmask 1043456   ;;  %v754_v16 = vlaneseq }
  0x49   :  { %164 = vmatprep.mubr.f32.mxu0 %v4501_v0  ;;  %3252 = vset.pattern.permute.xlu0 %v3390_v1  ;;  %v83_v3 = vld [vmem:[%s4494_s3] sm:$0xff]  ;;  %v90_v4 = vcombine.high %v80_v2, %v80_v2  ;;  %vm91_vm1 = vcmask 31744   ;;  %v173_v14 = vld [vmem:[#allocation7] sm:$0xff]  ;;  %vm180_vm2 = vcmask 64512   ;;  %vm795_vm4 = vcmask 130048   ;;  %v794_v20 = vld [vmem:[%s4499_s8 + $0x8] sm:$0xff] }
  0x4a   :  { %248 = vmatprep.mubr.f32.mxu1 %v4501_v0  ;;  %3253 = vset.pattern.permute.xlu1 %v3390_v1  ;;  %v82_v5 = vld [vmem:[%s4493_s2] sm:$0xff]  ;;  %v3514_v17 = vshrl.u32 %v754_v16, 7  ;;  %v3391_v19 = vmov 1.0   ;;  %v3130_v21 = vld [vmem:[%s4499_s8 + $0x10] sm:$0xff]  ;;  %v3131_v22 = vld [vmem:[%s4499_s8 + $0x18] sm:$0xff] }
  0x4b   :  { %86 = vperm.xlu0 %3252, %v83_v3   ;;  %v174_v6 = vld [vmem:[%s4496_s5] sm:$0xff]  ;;  %3097 = vmatprep.subr.msk.mxu0 %vm95_vm0, %v90_v4  ;;  %v257_v30 = vld [vmem:[#allocation8] sm:$0xf] }
  0x4c   :  { %3098 = vmatpush1.msk.msra.mxu0 %vm95_vm0, %v80_v2  ;;  %v258_v15 = vld [vmem:[%s4498_s7] sm:$0xf]  ;;  %4550 = vst [vmem:[#allocation15_spill] sm:$0xff] %v3514_v17  ;;  %vm757_vm3 = vcmp.eq.s32.totalorder %v3514_v17, 0 }
  0x4d   :  { %3099 = vmatmul.mubr.msk.f32.vlgmr.msra.gmra.mrb[0].mxu0 %vm91_vm1, %v82_v5  ;;  %261 = vperm.xlu1 %3253, %v258_v15   ;;  %v793_v18 = vld [vmem:[%s4499_s8] sm:$0xff]  ;;  %v3395_v15 = vmov 2102212464  }
  0x4e   :  { %331 = vmatprep.mubr.f32.mxu0 %v4501_v0 }
  0x4f   :  { %177 = vperm.xlu0 %3252, %v174_v6  }
  0xca   :  { %v87_v7 = vpop.permute.xlu0 %86 }
  0xcc   :  { %v262_v35 = vpop.permute.xlu1 %261 }
  0xce   :  { %v178_v23 = vpop.permute.xlu0 %177 }
 0x120   :  { %v166_v8 = vpop.f32.mrb[0].mxu0 }
 0x121   :  { %v167_v9 = vadd.f32 %v166_v8, %v87_v7  ;;  %v168_v10 = vpop.f32.mrb[1].mxu0 }
 0x122   :  { %v169_v11 = vadd.f32 %v168_v10, %v87_v7  ;;  %v3392_v7 = vmov 683565275  }
 0x123   :  { %v171_v13 = vmax.f32 %v167_v9, 0.0 }
 0x124   :  { %v172_v12 = vmax.f32 %v169_v11, 0.0  ;;  %v3393_v11 = vmov 2475754826  }
 0x126   :  { %184 = vmatprep.subr.mxu1 %v172_v12 }
 0x127   :  { %185 = vmatpush1.msra.mxu1 %v171_v13  ;;  %v3394_v13 = vmov 2131351028  }
 0x128   :  { %3100 = vmatmul.mubr.msk.f32.vlgmr.msra.gmra.mrb[0].mxu1 %vm180_vm2, %v173_v14  ;;  %3124 = vmatprep.subr.msk.mxu1 %vm757_vm3, %v3391_v19 }
 0x129   :  { %866 = vmatprep.mubr.f32.mxu1 %v4501_v0  ;;  %3125 = vmatpush1.msk.msra.mxu1 %vm757_vm3, %v3391_v19 }
 0x12a   :  { %3177 = vmatprep.subr.mxu1 %v4501_v0 }
 0x12c   :  { %3126 = vmatmul.mubr.msk.f32.vlgmr.msra.gmra.mrb[2].mxu1 %vm795_vm4, %v793_v18 }
 0x12d   :  { %872 = vmatprep.mubr.f32.mxu1 %v4501_v0  ;;  %3178 = vmatpush3.msra.mxu1 %v4501_v0 }
 0x130   :  { %3127 = vmatmul.mubr.msk.f32.gmra.mrb[4].mxu1 %vm795_vm4, %v794_v20 }
 0x131   :  { %3179 = vmatprep.mubr.msk.f32.mxu1 %vm795_vm4, %v3130_v21 }
 0x134   :  { %3180 = vmatmul.mubr.msk.f32.vlgmr.msra.gmra.mrb[6].mxu1 %vm795_vm4, %v3131_v22 }
 0x135   :  { %1452 = vmatprep.mubr.f32.mxu1 %v4501_v0 }
 0x1fb   :  { %v250_v24 = vpop.f32.mrb[0].mxu1 }
 0x1fc   :  { %v251_v25 = vadd.f32 %v250_v24, %v178_v23  ;;  %v252_v26 = vpop.f32.mrb[1].mxu1 }
 0x1fd   :  { %v253_v27 = vadd.f32 %v252_v26, %v178_v23 }
 0x1fe   :  { %v255_v29 = vmax.f32 %v251_v25, 0.0  ;;  %v3397_v25 = vmov 1326507024  }
 0x1ff   :  { %v256_v28 = vmax.f32 %v253_v27, 0.0  ;;  %v3555_v31 = vpop.f32.mrb[2].mxu1 }
 0x200   :  { %v3557_v32 = vpop.f32.mrb[3].mxu1 }
 0x201   :  { %267 = vmatprep.subr.mxu0 %v256_v28 }
 0x202   :  { %268 = vmatpush1.msra.mxu0 %v255_v29 }
 0x203   :  { %3101 = vmatmul.mubr.msk.f32.vlgmr.msra.gmra.mrb[2].mxu0 %vm180_vm2, %v257_v30  ;;  %3172 = vmatprep.subr.mxu0 %v4501_v0  ;;  %v3559_v33 = vpop.f32.mrb[4].mxu1 }
 0x204   :  { %3173 = vmatpush3.msra.mxu0 %v4501_v0  ;;  %3174 = vmatprep.mubr.msk.f32.mxu0 %vm795_vm4, %v793_v18  ;;  %v3561_v34 = vpop.f32.mrb[5].mxu1  ;;  %v3396_v18 = vmov 920167782  }
 0x205   :  { %3132 = vmatprep.subr.msk.mxu0 %vm757_vm3, %v3391_v19  ;;  %4551 = vst [vmem:[#allocation16_spill] sm:$0xff] %v3561_v34 }
 0x207   :  { %3175 = vmatmul.mubr.msk.f32.vlgmr.msra.gmra.mrb[4].mxu0 %vm795_vm4, %v794_v20  ;;  %v3574_v47 = vpop.f32.mrb[6].mxu1 }
 0x208   :  { %3133 = vmatpush1.msk.msra.mxu0 %vm757_vm3, %v3391_v19  ;;  %1029 = vmatprep.mubr.f32.mxu0 %v4501_v0  ;;  %v3583_v55 = vpop.f32.mrb[7].mxu1 }
 0x20b   :  { %3134 = vmatmul.mubr.msk.f32.vlgmr.msra.gmra.mrb[6].mxu0 %vm795_vm4, %v3130_v21 }
 0x20c   :  { %1035 = vmatprep.mubr.f32.mxu0 %v4501_v0 }
 0x20f   :  { %3135 = vmatmul.mubr.msk.f32.gmra.mrb[8].mxu0 %vm795_vm4, %v3131_v22 }
 0x210   :  { %1529 = vmatprep.mubr.f32.mxu0 %v4501_v0 }
 0x2d6   :  { %v333_v36 = vpop.f32.mrb[2].mxu0 }
 0x2d7   :  { %v334_v37 = vadd.f32 %v333_v36, %v262_v35  ;;  %v335_v38 = vpop.f32.mrb[3].mxu0 }
 0x2d8   :  { %v336_v39 = vadd.f32 %v335_v38, %v262_v35 }
 0x2d9   :  { %v3563_v40 = vmul.f32 0.5, %v334_v37 }
 0x2da   :  { %v3565_v41 = vmul.f32 0.5, %v336_v39  ;;  %v3567_v42 = vpop.f32.mrb[4].mxu0 }
 0x2db   :  { %v340_v43 = vand.u32 2147483647, %v3563_v40  ;;  %v343_v44 = vand.u32 2139095040, %v3563_v40  ;;  %v3571_v45 = vpop.f32.mrb[5].mxu0 }
 0x2dc   :  { %4552 = vst [vmem:[#allocation17_spill] sm:$0xff] %v3571_v45  ;;  %v446_v46 = vand.u32 2139095040, %v3565_v41  ;;  %v443_v50 = vand.u32 2147483647, %v3565_v41 }
 0x2dd   :  { %v344_v48 = vshrl.u32 %v343_v44, 23  ;;  %v347_v49 = vand.u32 8388607, %v340_v43 }
 0x2de   :  { %v447_v51 = vshrl.u32 %v446_v46, 23  ;;  %v3579_v52 = vpop.f32.mrb[6].mxu0  ;;  %v3587_v59 = vand.u32 8388607, %v443_v50 }
 0x2df   :  { %v3102_v53 = vadd.s32 4294967169, %v344_v48  ;;  %v3581_v54 = vpop.f32.mrb[7].mxu0  ;;  %v348_v58 = vor.u32 8388608, %v347_v49 }
 0x2e0   :  { %v3106_v56 = vadd.s32 4294967169, %v447_v51  ;;  %v451_v5 = vor.u32 8388608, %v3587_v59 }
 0x2e1   :  { %v350_v57 = vadd.s32 1, %v3102_v53  ;;  %v3593_v4 = vshll.u32 %v348_v58, 8 }
 0x2e2   :  { %v453_v60 = vadd.s32 1, %v3106_v56  ;;  %v3589_v61 = vpop.f32.mrb[8].mxu0 }
 0x2e3   :  { %vm351_vm5 = vcmp.gt.s32.totalorder %v350_v57, 0  ;;  %v3591_v62 = vpop.f32.mrb[9].mxu0 }
 0x2e4   :  { %v352_v63 = vsel %vm351_vm5, %v350_v57, 0  ;;  %vm454_vm6 = vcmp.gt.s32.totalorder %v453_v60, 0 }
 0x2e5   :  { %v353_v1 = vshrl.u32 %v352_v63, 5  ;;  %v354_v2 = vand.u32 31, %v352_v63  ;;  %v455_v3 = vsel %vm454_vm6, %v453_v60, 0 }
 0x2e6   :  { %v3596_v9 = vshrl.u32 %v455_v3, 5  ;;  %v457_v10 = vand.u32 31, %v455_v3 }
 0x2e7   :  { %v355_v6 = vsub.s32 32, %v354_v2  ;;  %v357_v8 = vshll.u32 %v3392_v7, %v354_v2  ;;  %v360_v12 = vshll.u32 %v3393_v11, %v354_v2  ;;  %v363_v14 = vshll.u32 %v3394_v13, %v354_v2 }
 0x2e8   :  { %v366_v16 = vshll.u32 %v3395_v15, %v354_v2  ;;  %v369_v19 = vshll.u32 %v3396_v18, %v354_v2  ;;  %vm372_vm7 = vcmp.lt.s32.totalorder %v353_v1, 1  ;;  %vm373_vm8 = vcmp.lt.s32.totalorder %v353_v1, 2 }
 0x2e9   :  { %v358_v20 = vshrl.u32 %v3393_v11, %v355_v6  ;;  %v361_v21 = vshrl.u32 %v3394_v13, %v355_v6  ;;  %v364_v22 = vshrl.u32 %v3395_v15, %v355_v6  ;;  %v356_v23 = vshrl.u32 %v3392_v7, %v355_v6 }
 0x2ea   :  { %v367_v24 = vshrl.u32 %v3396_v18, %v355_v6  ;;  %v370_v26 = vshrl.u32 %v3397_v25, %v355_v6  ;;  %v458_v30 = vsub.s32 32, %v457_v10  ;;  %vm374_vm9 = vcmp.lt.s32.totalorder %v353_v1, 3 }
 0x2eb   :  { %v359_v27 = vor.u32 %v358_v20, %v357_v8  ;;  %v362_v28 = vor.u32 %v361_v21, %v360_v12  ;;  %v365_v29 = vor.u32 %v364_v22, %v363_v14  ;;  %vm375_vm10 = vcmp.lt.s32.totalorder %v353_v1, 4 }
 0x2ec   :  { %v368_v35 = vor.u32 %v367_v24, %v366_v16  ;;  %v371_v36 = vor.u32 %v370_v26, %v369_v19  ;;  %v460_v51 = vshll.u32 %v3392_v7, %v457_v10  ;;  %v461_v57 = vshrl.u32 %v3393_v11, %v458_v30 }
 0x2ed   :  { %v376_v37 = vsel %vm372_vm7, %v356_v23, %v359_v27  ;;  %v377_v38 = vsel %vm375_vm10, %v365_v29, 2102212464  ;;  %v380_v39 = vsel %vm372_vm7, %v359_v27, %v362_v28  ;;  %v384_v44 = vsel %vm372_vm7, %v362_v28, %v365_v29 }
 0x2ee   :  { %v378_v46 = vsel %vm374_vm9, %v362_v28, %v377_v38  ;;  %v381_v48 = vsel %vm375_vm10, %v368_v35, 920167782  ;;  %v385_v49 = vsel %vm375_vm10, %v371_v36, 1326507024  ;;  %v463_v58 = vshll.u32 %v3393_v11, %v457_v10 }
 0x2ef   :  { %v382_v53 = vsel %vm374_vm9, %v365_v29, %v381_v48  ;;  %v386_v56 = vsel %vm374_vm9, %v368_v35, %v385_v49  ;;  %v379_v59 = vsel %vm373_vm8, %v376_v37, %v378_v46  ;;  %v464_v2 = vshrl.u32 %v3394_v13, %v458_v30 }
 0x2f0   :  { %v383_v60 = vsel %vm373_vm8, %v380_v39, %v382_v53  ;;  %v387_v63 = vsel %vm373_vm8, %v384_v44, %v386_v56  ;;  %v462_v14 = vor.u32 %v461_v57, %v460_v51  ;;  %v466_v19 = vshll.u32 %v3394_v13, %v457_v10  ;;  %v81_v57 = vld [vmem:[#allocation5] sm:$0xff] }
 0x2f1   :  { %v3605_v3 = vmul.u32.u64.low %v3593_v4, %v387_v63  ;;  %v3606_v6 = vmul.u32.u64.high %v3593_v4, %v387_v63, %v3605_v3  ;;  %v3609_v8 = vmul.u32.u64.low %v3593_v4, %v383_v60  ;;  %v3610_v12 = vmul.u32.u64.high %v3593_v4, %v383_v60, %v3609_v8 }
 0x2f2   :  { %v465_v16 = vor.u32 %v464_v2, %v463_v58  ;;  %v467_v11 = vshrl.u32 %v3395_v15, %v458_v30  ;;  %v469_v20 = vshll.u32 %v3395_v15, %v457_v10  ;;  %v470_v21 = vshrl.u32 %v3396_v18, %v458_v30 }
 0x2f3   :  { %v473_v22 = vshrl.u32 %v3397_v25, %v458_v30  ;;  %v491_v23 = vshll.u32 %v451_v5, 8  ;;  %v395_v1 = vmul.u32 %v3593_v4, %v379_v59  ;;  %v459_v24 = vshrl.u32 %v3392_v7, %v458_v30 }
 0x2f4   :  { %v468_v26 = vor.u32 %v467_v11, %v466_v19  ;;  %v472_v27 = vshll.u32 %v3396_v18, %v457_v10  ;;  %vm397_vm11 = vc.u32 %v3606_v6, %v3609_v8  ;;  %v398_v28 = vadd.s32 1, %v3610_v12 }
 0x2f5   :  { %v471_v29 = vor.u32 %v470_v21, %v469_v20  ;;  %vm475_vm12 = vcmp.lt.s32.totalorder %v3596_v9, 1  ;;  %vm477_vm13 = vcmp.lt.s32.totalorder %v3596_v9, 3  ;;  %vm478_vm14 = vcmp.lt.s32.totalorder %v3596_v9, 4 }
 0x2f6   :  { %v474_v35 = vor.u32 %v473_v22, %v472_v27  ;;  %v483_v13 = vsel %vm475_vm12, %v462_v14, %v465_v16  ;;  %v399_v5 = vsel %vm397_vm11, %v398_v28, %v3610_v12  ;;  %v480_v4 = vsel %vm478_vm14, %v468_v26, 2102212464 }
 0x2f7   :  { %v484_v7 = vsel %vm478_vm14, %v471_v29, 920167782  ;;  %v487_v15 = vsel %vm475_vm12, %v465_v16, %v468_v26  ;;  %v400_v10 = vadd.s32 %v399_v5, %v395_v1  ;;  %vm476_vm15 = vcmp.lt.s32.totalorder %v3596_v9, 2 }
 0x2f8   :  { %v485_v18 = vsel %vm477_vm13, %v468_v26, %v484_v7  ;;  %v488_v25 = vsel %vm478_vm14, %v474_v35, 1326507024  ;;  %v479_v30 = vsel %vm475_vm12, %v459_v24, %v462_v14  ;;  %v481_v36 = vsel %vm477_vm13, %v465_v16, %v480_v4 }
 0x2f9   :  { %v486_v37 = vsel %vm476_vm15, %v483_v13, %v485_v18  ;;  %v489_v38 = vsel %vm477_vm13, %v471_v29, %v488_v25  ;;  %v401_v39 = vadd.s32 536870912, %v400_v10  ;;  %v482_v56 = vsel %vm476_vm15, %v479_v30, %v481_v36 }
 0x2fa   :  { %v490_v44 = vsel %vm476_vm15, %v487_v15, %v489_v38  ;;  %v3622_v46 = vmul.u32.u64.low %v491_v23, %v486_v37  ;;  %v3623_v48 = vmul.u32.u64.high %v491_v23, %v486_v37, %v3622_v46  ;;  %v498_v59 = vmul.u32 %v491_v23, %v482_v56 }
 0x2fb   :  { %v3626_v49 = vmul.u32.u64.low %v491_v23, %v490_v44  ;;  %v3627_v51 = vmul.u32.u64.high %v491_v23, %v490_v44, %v3626_v49  ;;  %v3629_v53 = vshrl.u32 %v401_v39, 30  ;;  %vm763_vm1 = vcmp.eq.s32.totalorder %v81_v57, 0 }
 0x2fc   :  { %v501_v58 = vadd.s32 1, %v3623_v48  ;;  %vm766_vm2 = vcmp.eq.s32.totalorder %v81_v57, 1  ;;  %v3637_v16 = vsel %vm763_vm1, 1.0, %v4501_v0  ;;  %vm769_vm5 = vcmp.eq.s32.totalorder %v81_v57, 2 }
 0x2fd   :  { %v403_v9 = vshll.u32 %v3629_v53, 30  ;;  %vm500_vm0 = vc.u32 %v3627_v51, %v3622_v46  ;;  %4553 = vst [vmem:[#allocation18_spill] sm:$0xff] %v3637_v16  ;;  %v3640_v19 = vsel %vm766_vm2, 1.0, %v4501_v0  ;;  %v3648_v23 = vadd.s32 8, %v3514_v17 }
 0x2fe   :  { %v502_v63 = vsel %vm500_vm0, %v501_v58, %v3623_v48  ;;  %v778_v22 = vadd.f32 %v3640_v19, %v3637_v16  ;;  %v3651_v24 = vsel %vm769_vm5, 1.0, %v4501_v0  ;;  %vm772_vm6 = vcmp.eq.s32.totalorder %v81_v57, 3 }
 0x2ff   :  { %v404_v60 = vsub.s32 %v400_v10, %v403_v9  ;;  %v503_v2 = vadd.s32 %v502_v63, %v498_v59  ;;  %4554 = vst [vmem:[#allocation19_spill] sm:$0xff] %v3648_v23  ;;  %v783_v27 = vshra.s32 %v3514_v17, 3  ;;  %v784_v13 = vshra.s32 %v3648_v23, 3 }
 0x300   :  { %v779_v35 = vadd.f32 %v3651_v24, %v778_v22  ;;  %v396_v5 = vadd.s32 %v3609_v8, %v3606_v6  ;;  %v3659_v15 = vsel %vm772_vm6, 1.0, %v4501_v0  ;;  %vm775_vm8 = vcmp.eq.s32.totalorder %v81_v57, 4 }
 0x301   :  { %v406_v3 = vsub.s32 0, %v404_v60  ;;  %v504_v12 = vadd.s32 536870912, %v503_v2  ;;  %v785_v18 = vand.u32 1, %v783_v27  ;;  %v1119_v39 = vadd.f32 %v3651_v24, %v3640_v19 }
 0x302   :  { %v780_v38 = vadd.f32 %v3659_v15, %v779_v35  ;;  %v786_v44 = vand.u32 1, %v784_v13  ;;  %v3665_v8 = vsel %vm775_vm8, 1.0, %v4501_v0  ;;  %v3668_v49 = vsub.s32 0, %v3514_v17 }
 0x303   :  { %v3103_v14 = vmin.u32 %v406_v3, %v404_v60  ;;  %v3642_v11 = vshrl.u32 %v504_v12, 30  ;;  %4555 = vst [vmem:[#allocation20_spill] sm:$0xff] %v3665_v8  ;;  %v3670_v9 = vcvt.s32.f32 %v785_v18  ;;  %v1378_v58 = vshra.s32 %v3514_v17, 2 }
 0x304   :  { %v3674_v59 = vadd.f32 %v3665_v8, %v780_v38  ;;  %v3679_v63 = vcvt.s32.f32 %v786_v44  ;;  %vm342_vm10 = vcmp.lt.s32.totalorder %v3563_v40, 0  ;;  %vm445_vm11 = vcmp.lt.s32.totalorder %v3565_v41, 0 }
 0x305   :  { %v408_v20 = vclz %v3103_v14  ;;  %v506_v21 = vshll.u32 %v3642_v11, 30  ;;  %v1133_v14 = vrot.slane %v3637_v16, %v3668_v49  ;;  %v1380_v35 = vand.u32 1, %v1378_v58 }
 0x306   :  { %v790_v18 = vmul.f32 2.0, %v3679_v63  ;;  %vm444_vm12 = vcmp.le.f32.partialorder %v443_v50, 0.7853982  ;;  %vm432_vm5 = vweird.f32 %v3563_v40 }
 0x307   :  { %v3104_v1 = vadd.s32 4294967294, %v408_v20  ;;  %v507_v26 = vsub.s32 %v503_v2, %v506_v21  ;;  %v499_v20 = vadd.s32 %v3622_v46, %v3627_v51  ;;  %v3704_v38 = vcvt.s32.f32 %v1380_v35 }
 0x309   :  { %vm3105_vm7 = vcmp.lt.s32.totalorder %v3104_v1, 0  ;;  %v509_v29 = vsub.s32 0, %v507_v26  ;;  %4556 = vst [vmem:[#allocation21_spill] sm:$0xff] %v3704_v38 }
 0x30a   :  { %v411_v28 = vsel %vm3105_vm7, 0, %v3104_v1  ;;  %v789_v1 = vmul.f32 2.0, %v3670_v9 }
 0x30b   :  { %v412_v4 = vsub.s32 32, %v411_v28  ;;  %v416_v7 = vsub.s32 4294967266, %v411_v28  ;;  %v3107_v10 = vmin.u32 %v509_v29, %v507_v26  ;;  %v413_v25 = vshll.u32 %v404_v60, %v411_v28 }
 0x30c   :  { %v3677_v60 = vadd.f32 %v3659_v15, %v1119_v39  ;;  %v426_v28 = vsub.s32 4, %v3629_v53  ;;  %v3690_v29 = vsel %vm757_vm3, 1.0, %v4501_v0  ;;  %vm341_vm3 = vcmp.le.f32.partialorder %v340_v43, 0.7853982 }
 0x30d   :  { %v414_v30 = vshrl.u32 %v396_v5, %v412_v4  ;;  %v417_v36 = vadd.s32 127, %v416_v7  ;;  %v511_v37 = vclz %v3107_v10  ;;  %v3693_v7 = vsub.s32 4, %v3514_v17 }
 0x30e   :  { %v1143_v10 = vrot.slane %v1133_v14, %v3668_v49  ;;  %v3715_v43 = vsub.f32 1.0, %v790_v18  ;;  %v1384_v14 = vmul.f32 2.0, %v3704_v38 }
 0x30f   :  { %v415_v48 = vor.u32 %v414_v30, %v413_v25  ;;  %v418_v6 = vshll.u32 %v417_v36, 23  ;;  %v3108_v56 = vadd.s32 4294967294, %v511_v37  ;;  %v3699_v36 = vsub.f32 1.0, %v789_v1 }
 0x310   :  { %v427_v37 = vsel %vm342_vm10, %v426_v28, %v3629_v53 }
 0x311   :  { %v419_v57 = vor.u32 4788187, %v418_v6  ;;  %vm3109_vm9 = vcmp.lt.s32.totalorder %v3108_v56, 0  ;;  %v422_v3 = vcvt.s32.f32 %v415_v48  ;;  %v1137_v48 = vrot.slane %v3637_v16, %v3693_v7 }
 0x312   :  { %v514_v12 = vsel %vm3109_vm9, 0, %v3108_v56  ;;  %v1379_v6 = vshra.s32 %v3648_v23, 2  ;;  %v1181_v56 = vrot.slane %v3665_v8, %v3668_v49  ;;  %v429_v53 = vsel %vm341_vm3, 0, %v427_v37 }
 0x313   :  { %v420_v2 = vand.u32 2147483647, %v419_v57  ;;  %v515_v21 = vsub.s32 32, %v514_v12  ;;  %v519_v22 = vsub.s32 4294967266, %v514_v12  ;;  %v516_v13 = vshll.u32 %v507_v26, %v514_v12 }
 0x314   :  { %v3713_v57 = vmul.f32 0.70710677, %v3637_v16  ;;  %v4503_v12 = vsub.f32 1.0, %v3670_v9  ;;  %v1147_v1 = vrot.slane %v1137_v48, %v3668_v49  ;;  %v639_v28 = vadd.s32 3, %v429_v53 }
 0x315   :  { %v423_v27 = vmul.f32 %v422_v3, %v420_v2  ;;  %v517_v5 = vshrl.u32 %v499_v20, %v515_v21  ;;  %v520_v4 = vadd.s32 127, %v519_v22  ;;  %v1127_v3 = vmul.f32 0.70710677, %v3699_v36 }
 0x316   :  { %4557 = vst [vmem:[#allocation22_spill] sm:$0xff] %v3713_v57  ;;  %v3721_v20 = vsub.s32 1, %v3514_v17  ;;  %v529_v22 = vsub.s32 4, %v3642_v11  ;;  %v3726_v35 = vrot.slane %v1181_v56, %v3668_v49  ;;  %v1267_v18 = vrot.slane %v3713_v57, %v3693_v7 }
 0x317   :  { %v424_v46 = vxor.u32 2147483648, %v423_v27  ;;  %v518_v25 = vor.u32 %v517_v5, %v516_v13  ;;  %v521_v30 = vshll.u32 %v520_v4, 23  ;;  %v1185_v13 = vrot.slane %v3665_v8, %v3693_v7 }
 0x318   :  { %4558 = vst [vmem:[#allocation23_spill] sm:$0xff] %v3721_v20  ;;  %v1128_v5 = vmul.f32 0.70710677, %v3715_v43  ;;  %v1710_v37 = vrot.slane %v3637_v16, %v3721_v20  ;;  %v640_v56 = vand.u32 3, %v639_v28  ;;  %v1756_v28 = vrot.slane %v3665_v8, %v3721_v20 }
 0x319   :  { %v425_v26 = vsel %vm342_vm10, %v424_v46, %v423_v27  ;;  %v522_v44 = vor.u32 4788187, %v521_v30  ;;  %v525_v2 = vcvt.s32.f32 %v518_v25  ;;  %v1381_v27 = vand.u32 1, %v1379_v6 }
 0x31a   :  { %v428_v39 = vsel %vm341_vm3, %v3563_v40, %v425_v26  ;;  %v1263_v46 = vrot.slane %v3713_v57, %v3668_v49  ;;  %v1176_v25 = vsub.f32 1.0, %v3679_v63  ;;  %v3737_v30 = vmul.f32 %v1143_v10, %v1127_v3 }
 0x31b   :  { %3255 = vcosq.f32 %v428_v39  ;;  %v523_v58 = vand.u32 2147483647, %v522_v44  ;;  %v3739_v26 = vsub.f32 1.0, %v1384_v14  ;;  %v530_v44 = vsel %vm445_vm11, %v529_v22, %v3642_v11 }
 0x31c   :  { %3257 = vsinq.f32 %v428_v39  ;;  %v3746_v48 = vcvt.s32.f32 %v1381_v27  ;;  %v433_v6 = vand.u32 3, %v429_v53  ;;  %v3754_v14 = vmul.f32 %v3726_v35, %v4503_v12 }
 0x31d   :  { %v526_v21 = vmul.f32 %v525_v2, %v523_v58  ;;  %4559 = vst [vmem:[#allocation24_spill] sm:$0xff] %v3739_v26  ;;  %v3749_v2 = vmul.f32 %v1147_v1, %v1127_v3  ;;  %v3757_v0 = vrot.slane %v1185_v13, %v3668_v49  ;;  %v3759_v50 = vmul.f32 %v1143_v10, %v1128_v5 }
 0x31e   :  { %4560 = vst [vmem:[#allocation25_spill] sm:$0xff] %v3746_v48  ;;  %v3762_v53 = vmul.f32 0.70710677, %v3739_v26  ;;  %v3765_v3 = vrot.slane %v1710_v37, %v3721_v20  ;;  %v1385_v10 = vmul.f32 2.0, %v3746_v48  ;;  %vm435_vm13 = vcmp.eq.s32.totalorder %v433_v6, 0 }
 0x31f   :  { %v527_v4 = vxor.u32 2147483648, %v526_v21  ;;  %vm438_vm14 = vcmp.eq.s32.totalorder %v433_v6, 2  ;;  %vm645_vm15 = vcmp.eq.s32.totalorder %v640_v56, 2  ;;  %vm642_vm0 = vcmp.eq.s32.totalorder %v640_v56, 0 }
 0x320   :  { %vm434_vm1 = vcmp.lt.s32.totalorder %v433_v6, 2  ;;  %vm641_vm2 = vcmp.lt.s32.totalorder %v640_v56, 2  ;;  %v3778_v34 = vsub.f32 1.0, %v1385_v10  ;;  %v3781_v6 = vrot.slane %v1263_v46, %v3668_v49 }
 0x321   :  { %v528_v39 = vsel %vm445_vm11, %v527_v4, %v526_v21  ;;  %v532_v21 = vsel %vm444_vm12, 0, %v530_v44  ;;  %v3770_v4 = vsub.s32 5, %v3514_v17  ;;  %v3784_v56 = vrot.slane %v1267_v18, %v3668_v49 }
 0x322   :  { %v531_v58 = vsel %vm444_vm12, %v3565_v41, %v528_v39  ;;  %4562 = vst [vmem:[#allocation27_spill] sm:$0xff] %v3778_v34  ;;  %v4563_v40 = vsub.f32 1.0, %v3670_v9  ;;  %v1283_v46 = vmul.f32 %v3726_v35, %v3670_v9  ;;  %v3803_v18 = vmul.f32 %v3765_v3, %v3762_v53 }
 0x323   :  { %3259 = vcosq.f32 %v531_v58  ;;  %4561 = vst [vmem:[#allocation26_spill] sm:$0xff] %v3770_v4  ;;  %v1714_v23 = vrot.slane %v3637_v16, %v3770_v4  ;;  %v1760_v45 = vrot.slane %v3665_v8, %v3770_v4  ;;  %v1751_v10 = vsub.f32 1.0, %v3704_v38 }
 0x324   :  { %3261 = vsinq.f32 %v531_v58  ;;  %v743_v58 = vadd.s32 3, %v532_v21  ;;  %4565 = vst [vmem:[#allocation29_spill] sm:$0xff] %v3803_v18  ;;  %vm535_vm11 = vweird.f32 %v3565_v41  ;;  %v1285_v4 = vmul.f32 %v3726_v35, %v3679_v63 }
 0x325   :  { %v3256_v11 = vpop.eup %3255 }
 0x326   :  { %v3258_v22 = vpop.eup %3257  ;;  %v439_v27 = vxor.u32 2147483648, %v3256_v11 }
 0x327   :  { %v436_v13 = vxor.u32 2147483648, %v3258_v22 }
 0x328   :  { %v440_v39 = vsel %vm438_vm14, %v439_v27, %v3258_v22  ;;  %v647_v44 = vsel %vm645_vm15, %v439_v27, %v3258_v22  ;;  %v536_v22 = vand.u32 3, %v532_v21  ;;  %v744_v27 = vand.u32 3, %v743_v58 }
 0x329   :  { %v437_v37 = vsel %vm435_vm13, %v3256_v11, %v436_v13  ;;  %v644_v51 = vsel %vm642_vm0, %v3256_v11, %v436_v13  ;;  %v3797_v11 = vmul.f32 %v3757_v0, %v1176_v25  ;;  %v3807_v13 = vrot.slane %v1756_v28, %v3721_v20 }
 0x32a   :  { %v441_v12 = vsel %vm434_vm1, %v437_v37, %v440_v39  ;;  %v648_v57 = vsel %vm641_vm2, %v644_v51, %v647_v44  ;;  %v3789_v51 = vmul.f32 %v3757_v0, %v4563_v40  ;;  %vm541_vm6 = vcmp.eq.s32.totalorder %v536_v22, 2 }
 0x32b   :  { %v442_v17 = vsel %vm432_vm5, nan, %v441_v12  ;;  %v649_v26 = vsel %vm432_vm5, nan, %v648_v57  ;;  %v3792_v57 = vmul.f32 %v3726_v35, %v1176_v25  ;;  %v3794_v12 = vmul.f32 %v1147_v1, %v1128_v5  ;;  %4564 = vst [vmem:[#allocation28_spill] sm:$0xff] %v3797_v11 }
 0x32c   :  { %v1724_v1 = vrot.slane %v1714_v23, %v3721_v20  ;;  %v3811_v5 = vrot.slane %v1760_v45, %v3721_v20  ;;  %v1706_v25 = vmul.f32 0.70710677, %v3778_v34  ;;  %vm749_vm7 = vcmp.eq.s32.totalorder %v744_v27, 2 }
 0x32d   :  { %v3260_v21 = vpop.eup %3259  ;;  %v1752_v37 = vsub.f32 1.0, %v3746_v48  ;;  %vm538_vm8 = vcmp.eq.s32.totalorder %v536_v22, 0  ;;  %vm746_vm9 = vcmp.eq.s32.totalorder %v744_v27, 0  ;;  %vm537_vm10 = vcmp.lt.s32.totalorder %v536_v22, 2 }
 0x32e   :  { %v3262_v39 = vpop.eup %3261  ;;  %v542_v44 = vxor.u32 2147483648, %v3260_v21  ;;  %4566 = vst [vmem:[#allocation30_spill] sm:$0xff] %v3811_v5  ;;  %vm745_vm3 = vcmp.lt.s32.totalorder %v744_v27, 2  ;;  %v1204_v16 = vsub.f32 0.0, %v649_v26  ;;  %v1286_v48 = vmul.f32 %v3757_v0, %v3679_v63 }
 0x32f   :  { %v539_v58 = vxor.u32 2147483648, %v3262_v39  ;;  %v3821_v22 = vmul.f32 %v3807_v13, %v1751_v10  ;;  %v1284_v26 = vmul.f32 %v3757_v0, %v3670_v9  ;;  %v3826_v41 = vmul.f32 %v1724_v1, %v3762_v53 }
 0x330   :  { %v543_v40 = vsel %vm541_vm6, %v542_v44, %v3262_v39  ;;  %v751_v38 = vsel %vm749_vm7, %v542_v44, %v3262_v39  ;;  %v3834_v35 = vmul.f32 %v1724_v1, %v1706_v25  ;;  %v3840_v27 = vmul.f32 %v3807_v13, %v1752_v37 }
 0x331   :  { %v540_v28 = vsel %vm538_vm8, %v3260_v21, %v539_v58  ;;  %v748_v8 = vsel %vm746_vm9, %v3260_v21, %v539_v58  ;;  %v3837_v63 = vmul.f32 0.0, %v1284_v26  ;;  %v3843_v0 = vmul.f32 %v1283_v46, %v3579_v52 }
 0x332   :  { %v544_v45 = vsel %vm537_vm10, %v540_v28, %v543_v40  ;;  %v752_v23 = vsel %vm745_vm3, %v748_v8, %v751_v38  ;;  %v3829_v8 = vmul.f32 %v3811_v5, %v1751_v10  ;;  %v3832_v38 = vmul.f32 %v3765_v3, %v1706_v25 }
 0x333   :  { %v545_v18 = vsel %vm535_vm11, nan, %v544_v45  ;;  %v753_v34 = vsel %vm535_vm11, nan, %v752_v23  ;;  %v3845_v9 = vmul.f32 0.0, %v1286_v48  ;;  %v3848_v53 = vmul.f32 %v3811_v5, %v1752_v37 }
 0x334   :  { %v1123_v20 = vcombine.low %v442_v17, %v545_v18  ;;  %v1205_v11 = vsub.f32 0.0, %v753_v34  ;;  %v3851_v3 = vmul.f32 %v3574_v47, %v1285_v4  ;;  %v4567_v21 = vsub.f32 1.0, %v3674_v59 }
 0x335   :  { %v3870_v18 = vmul.f32 %v1285_v4, %v3589_v61  ;;  %v3873_v47 = vmul.f32 %v1286_v48, %v3591_v62  ;;  %v3876_v59 = vmul.f32 %v1283_v46, %v3583_v55 }
 0x336   :  { %v1125_v17 = vmul.f32 %v1123_v20, %v3677_v60  ;;  %v1208_v34 = vcombine.low %v1204_v16, %v1205_v11  ;;  %v3867_v11 = vmul.f32 %v1284_v26, %v3581_v54 }
 0x338   :  { %v3855_v60 = vadd.f32 %v1125_v17, %v4567_v21  ;;  %v3858_v16 = vmul.f32 %v3659_v15, %v1208_v34  ;;  %v3861_v20 = vmul.f32 %v3651_v24, %v1208_v34  ;;  %v3864_v52 = vmul.f32 %v3640_v19, %v1208_v34 }
 0x33a   :  { %4568 = vst [vmem:[#allocation31_spill] sm:$0xff] %v3858_v16  ;;  %4569 = vst [vmem:[#allocation32_spill] sm:$0xff] %v3864_v52  ;;  %v1156_v15 = vrot.slane %v3855_v60, %v3668_v49  ;;  %v1215_v24 = vrot.slane %v3858_v16, %v3668_v49  ;;  %v1240_v19 = vrot.slane %v3861_v20, %v3668_v49 }
 0x33b   :  { %v1311_v54 = vrot.slane %v3864_v52, %v3668_v49  ;;  %v1160_v61 = vrot.slane %v3855_v60, %v3693_v7  ;;  %v1219_v62 = vrot.slane %v3858_v16, %v3693_v7  ;;  %v1244_v55 = vrot.slane %v3861_v20, %v3693_v7 }
 0x33c   :  { %v1315_v48 = vrot.slane %v3864_v52, %v3693_v7  ;;  %v1166_v4 = vrot.slane %v1156_v15, %v3668_v49  ;;  %v1225_v46 = vrot.slane %v1215_v24, %v3668_v49  ;;  %v1250_v10 = vrot.slane %v1240_v19, %v3668_v49 }
 0x33d   :  { %v1321_v39 = vrot.slane %v1311_v54, %v3668_v49  ;;  %v1170_v44 = vrot.slane %v1160_v61, %v3668_v49  ;;  %v1229_v1 = vrot.slane %v1219_v62, %v3668_v49  ;;  %v1254_v25 = vrot.slane %v1244_v55, %v3668_v49 }
 0x33e   :  { %v3902_v58 = vrot.slane %v1315_v48, %v3668_v49  ;;  %v1171_v37 = vadd.f32 %v1166_v4, %v3737_v30  ;;  %v1230_v7 = vmul.f32 %v1225_v46, %v3699_v36  ;;  %v1255_v40 = vmul.f32 %v1250_v10, %v3699_v36 }
 0x33f   :  { %v3908_v28 = vmul.f32 %v1321_v39, %v3555_v31  ;;  %v1172_v45 = vadd.f32 %v1170_v44, %v3749_v2  ;;  %v1231_v23 = vmul.f32 %v1229_v1, %v3699_v36  ;;  %v1256_v26 = vmul.f32 %v1254_v25, %v3699_v36 }
 0x340   :  { %v1363_v17 = vmul.f32 %v3902_v58, %v3557_v32  ;;  %v1200_v49 = vadd.f32 %v3754_v14, %v1171_v37  ;;  %v1278_v30 = vadd.f32 %v3781_v6, %v1255_v40  ;;  %v1291_v34 = vmul.f32 0.0, %v1230_v7 }
 0x341   :  { %v1173_v21 = vadd.f32 %v1166_v4, %v3759_v50  ;;  %v1201_v15 = vadd.f32 %v3789_v51, %v1172_v45  ;;  %v1279_v24 = vadd.f32 %v3784_v56, %v1256_v26  ;;  %v1292_v19 = vmul.f32 0.0, %v1231_v23 }
 0x342   :  { %v1347_v2 = vmul.f32 %v3690_v29, %v1231_v23  ;;  %v1287_v54 = vmul.f32 %v3690_v29, %v1200_v49  ;;  %v1299_v36 = vmul.f32 %v1278_v30, %v3555_v31  ;;  %v1232_v14 = vmul.f32 %v1225_v46, %v3715_v43 }
 0x343   :  { %v1202_v61 = vadd.f32 %v3792_v57, %v1173_v21  ;;  %v1288_v62 = vmul.f32 %v3690_v29, %v1201_v15  ;;  %v1300_v55 = vmul.f32 %v1279_v24, %v3557_v32  ;;  %v1343_v50 = vmul.f32 0.0, %v1201_v15 }
 0x344   :  { %v1355_v48 = vmul.f32 0.0, %v1279_v24  ;;  %v1295_v51 = vsub.f32 %v1287_v54, %v1291_v34  ;;  %v1257_v4 = vmul.f32 %v1250_v10, %v3715_v43  ;;  %v1293_v40 = vmul.f32 0.0, %v1232_v14  ;;  %v4570_v54 = vld [vmem:[#allocation16_spill] sm:$0xff] }
 0x345   :  { %v1289_v37 = vmul.f32 0.0, %v1202_v61  ;;  %v1296_v45 = vsub.f32 %v1288_v62, %v1292_v19  ;;  %v1351_v23 = vadd.f32 %v1347_v2, %v1343_v50  ;;  %v3929_v26 = vmul.f32 %v1321_v39, %v3559_v33  ;;  %v4571_v14 = vld [vmem:[#allocation28_spill] sm:$0xff]  ;;  %v4572_v50 = vld [vmem:[#allocation17_spill] sm:$0xff] }
 0x346   :  { %v1328_v31 = vmul.f32 %v3567_v42, %v1321_v39  ;;  %v1303_v57 = vadd.f32 %v1299_v36, %v1295_v51  ;;  %v1280_v46 = vadd.f32 %v3781_v6, %v1257_v4  ;;  %v1174_v34 = vadd.f32 %v1170_v44, %v3794_v12 }
 0x347   :  { %v1297_v21 = vsub.f32 %v1289_v37, %v1293_v40  ;;  %v1352_v5 = vadd.f32 %v1293_v40, %v1289_v37  ;;  %v1304_v32 = vadd.f32 %v1300_v55, %v1296_v45  ;;  %v1359_v15 = vadd.f32 %v1355_v48, %v1351_v23  ;;  %v4573_v37 = vld [vmem:[#allocation23_spill] sm:$0xff] }
 0x348   :  { %v1233_v10 = vmul.f32 %v1229_v1, %v3715_v43  ;;  %v1301_v24 = vmul.f32 %v1280_v46, %v3559_v33  ;;  %v1356_v19 = vmul.f32 %v3567_v42, %v1280_v46  ;;  %v1258_v2 = vmul.f32 %v1254_v25, %v3715_v43  ;;  %v4574_v46 = vld [vmem:[#allocation26_spill] sm:$0xff] }
 0x349   :  { %v1365_v61 = vmul.f32 %v3902_v58, %v4570_v54  ;;  %v1367_v36 = vadd.f32 %v1363_v17, %v1359_v15  ;;  %v1203_v6 = vadd.f32 %v4571_v14, %v1174_v34  ;;  %v1326_v55 = vmul.f32 %v1321_v39, %v4572_v50  ;;  %v4575_v15 = vld [vmem:[#allocation29_spill] sm:$0xff] }
 0x34a   :  { %v1294_v62 = vmul.f32 0.0, %v1233_v10  ;;  %v1305_v48 = vadd.f32 %v1301_v24, %v1297_v21  ;;  %v1360_v51 = vadd.f32 %v1356_v19, %v1352_v5  ;;  %v1281_v12 = vadd.f32 %v3784_v56, %v1258_v2 }
 0x34b   :  { %v1342_v44 = vmul.f32 0.0, %v1200_v49  ;;  %v1290_v1 = vmul.f32 0.0, %v1203_v6  ;;  %v1330_v33 = vsub.f32 %v1303_v57, %v1326_v55  ;;  %v1346_v42 = vmul.f32 %v3690_v29, %v1230_v7 }
 0x34c   :  { %v1354_v43 = vmul.f32 %v1278_v30, %v4572_v50  ;;  %v1332_v25 = vsub.f32 %v1305_v48, %v1328_v31  ;;  %v1302_v4 = vmul.f32 %v1281_v12, %v4570_v54  ;;  %v1357_v17 = vmul.f32 0.0, %v1281_v12 }
 0x34d   :  { %v1732_v40 = vrot.slane %v3855_v60, %v4573_v37  ;;  %v1298_v45 = vsub.f32 %v1290_v1, %v1294_v62  ;;  %v1353_v39 = vadd.f32 %v1294_v62, %v1290_v1  ;;  %v1350_v23 = vadd.f32 %v1346_v42, %v1342_v44 }
 0x34e   :  { %v1338_v5 = vadd.f32 %v3843_v0, %v1330_v33  ;;  %v1782_v49 = vrot.slane %v3858_v16, %v4573_v37  ;;  %v1327_v29 = vmul.f32 0.0, %v3902_v58  ;;  %v1375_v7 = vadd.f32 %v3837_v63, %v1367_v36  ;;  %v4576_v36 = vld [vmem:[#allocation24_spill] sm:$0xff] }
 0x34f   :  { %v1742_v56 = vrot.slane %v1732_v40, %v4573_v37  ;;  %v1306_v30 = vadd.f32 %v1302_v4, %v1298_v45  ;;  %v1361_v31 = vadd.f32 %v1357_v17, %v1353_v39  ;;  %v1358_v57 = vadd.f32 %v1354_v43, %v1350_v23 }
 0x350   :  { %v1736_v21 = vrot.slane %v3855_v60, %v4574_v46  ;;  %v1792_v10 = vrot.slane %v1782_v49, %v4573_v37  ;;  %v1331_v0 = vsub.f32 %v1304_v32, %v1327_v29  ;;  %v1786_v24 = vrot.slane %v3858_v16, %v4574_v46  ;;  %v3263_v49 = vld [vmem:[%s4499_s8 + $0x10] sm:$0xff] }
 0x351   :  { %v1747_v34 = vadd.f32 %v1742_v56, %v4575_v15  ;;  %v1369_v19 = vadd.f32 %v1365_v61, %v1361_v31  ;;  %v1340_v58 = vadd.f32 %v3870_v18, %v1332_v25  ;;  %v1749_v63 = vadd.f32 %v1742_v56, %v3832_v38  ;;  %v4577_v61 = vld [vmem:[#allocation27_spill] sm:$0xff] }
 0x352   :  { %v1746_v2 = vrot.slane %v1736_v21, %v4573_v37  ;;  %v1797_v14 = vmul.f32 %v1792_v10, %v4576_v36  ;;  %v1339_v6 = vadd.f32 %v3867_v11, %v1331_v0  ;;  %v1796_v62 = vrot.slane %v1786_v24, %v4573_v37  ;;  %v4026_v0 = vld [vmem:[%s4499_s8 + $0x20] sm:$0xff] }
 0x353   :  { %v1775_v54 = vadd.f32 %v3821_v22, %v1747_v34  ;;  %v3184_v50 = vpack.c.bf16 %v1340_v58, %v1338_v5  ;;  %v1777_v55 = vadd.f32 %v3840_v27, %v1749_v63  ;;  %v1799_v48 = vmul.f32 %v1792_v10, %v4577_v61  ;;  %v3264_v34 = vld [vmem:[%s4499_s8 + $0x18] sm:$0xff] }
 0x354   :  { %v1748_v32 = vadd.f32 %v1746_v2, %v3826_v41  ;;  %v1907_v18 = vmul.f32 %v1797_v14, %v1338_v5  ;;  %v1798_v38 = vmul.f32 %v1796_v62, %v4576_v36  ;;  %v1333_v44 = vsub.f32 %v1306_v30, %v1327_v29  ;;  %v4580_v63 = vld [vmem:[#allocation19_spill] sm:$0xff] }
 0x355   :  { %v3970_v12 = vmul.f32 %v1775_v54, %v1338_v5  ;;  %v3974_v1 = vmul.f32 %v1777_v55, %v1340_v58  ;;  %v1909_v11 = vmul.f32 %v1799_v48, %v1340_v58  ;;  %v1377_v33 = vadd.f32 %v3845_v9, %v1369_v19  ;;  %v4038_v19 = vld [vmem:[%s4499_s8 + $0x28] sm:$0xff] }
 0x356   :  { %v1776_v22 = vadd.f32 %v3829_v8, %v1748_v32  ;;  %v1908_v42 = vmul.f32 %v1798_v38, %v1339_v6  ;;  %v1341_v41 = vadd.f32 %v3873_v47, %v1333_v44  ;;  %v1750_v27 = vadd.f32 %v1746_v2, %v3834_v35  ;;  %v4579_v2 = vld [vmem:[#allocation15_spill] sm:$0xff] }
 0x357   :  { %v1800_v43 = vmul.f32 %v1796_v62, %v4577_v61  ;;  %v1368_v4 = vadd.f32 %v3929_v26, %v1360_v51  ;;  %v1366_v17 = vadd.f32 %v3908_v28, %v1358_v57  ;;  %v3186_v40 = vpack.c.bf16 %v1377_v33, %v1375_v7 }
 0x358   :  { %v3980_v25 = vmul.f32 %v1776_v22, %v1339_v6  ;;  %v1778_v8 = vadd.f32 %v3848_v53, %v1750_v27  ;;  %v3182_v39 = vpack.c.bf16 %v1341_v41, %v1339_v6  ;;  %v3989_v35 = vmul.f32 %v1798_v38, %v1375_v7  ;;  %v4584_v38 = vld [vmem:[#allocation18_spill] sm:$0xff] }
 0x359   :  { %v1910_v45 = vmul.f32 %v1800_v43, %v1341_v41  ;;  %v1376_v9 = vadd.f32 %v3851_v3, %v1368_v4  ;;  %v1374_v23 = vadd.f32 %v3876_v59, %v1366_v17  ;;  %3187 = vmatprep.subr.bf16.mxu0 %v3186_v40  ;;  %v1904_v56 = vmul.f32 %v1776_v22, %v1375_v7  ;;  %v4587_v27 = vld [vmem:[#allocation22_spill] sm:$0xff] }
 0x35a   :  { %v3987_v47 = vmul.f32 %v1778_v8, %v1341_v41  ;;  %3183 = vmatprep.subr.bf16.mxu1 %v3182_v39  ;;  %v4578_v30 = vmov 0.0   ;;  %v4013_v21 = vmul.f32 %v1800_v43, %v1377_v33  ;;  %v1906_v15 = vmul.f32 %v1778_v8, %v1377_v33 }
 0x35b   :  { %v3991_v5 = vmul.f32 %v1799_v48, %v1376_v9  ;;  %v1905_v26 = vmul.f32 %v1777_v55, %v1376_v9  ;;  %v3188_v51 = vpack.c.bf16 %v1376_v9, %v1374_v23  ;;  %v3993_v28 = vmul.f32 %v1797_v14, %v1374_v23  ;;  %3185 = vmatpush1.bf16.msra.mxu1 %v3184_v50 }
 0x35c   :  { %v1903_v53 = vmul.f32 %v1775_v54, %v1374_v23  ;;  %3191 = vmatprep.subr.bf16.mxu1 %v3182_v39  ;;  %v4006_v31 = vadd.f32 %v1908_v42, %v1904_v56  ;;  %v4028_v24 = vadd.f32 %v1910_v45, %v1906_v15  ;;  %v1939_v58 = vshra.s32 %v4579_v2, 1 }
 0x35d   :  { %3189 = vmatpush1.bf16.msra.mxu0 %v3188_v51  ;;  %v4011_v7 = vadd.f32 %v1909_v11, %v1905_v26  ;;  %v1940_v54 = vshra.s32 %v4580_v63, 1  ;;  %v4057_v55 = vsub.s32 2, %v4579_v2  ;;  %v4065_v22 = vsub.s32 6, %v4579_v2  ;;  %v4585_v11 = vld [vmem:[#allocation20_spill] sm:$0xff] }
 0x35e   :  { %3195 = vmatprep.subr.bf16.mxu0 %v3186_v40  ;;  %3138 = vmatmul.mubr.msk.f32.vlgmr.msra.gmra.mrb[8].mxu1 %vm795_vm4, %v3263_v49  ;;  %v4003_v29 = vadd.f32 %v1907_v18, %v1903_v53  ;;  %v1941_v14 = vand.u32 1, %v1939_v58  ;;  %v1804_v41 = vrot.slane %v3861_v20, %v4573_v37  ;;  %v1826_v43 = vrot.slane %v4587_v27, %v4573_v37 }
 0x35f   :  { %3193 = vmatpush1.bf16.msra.mxu1 %v3184_v50  ;;  %1458 = vmatprep.mubr.f32.mxu1 %v4578_v30  ;;  %v1942_v6 = vand.u32 1, %v1940_v54  ;;  %v2271_v44 = vrot.slane %v4584_v38, %v4057_v55  ;;  %v2317_v33 = vrot.slane %v4585_v11, %v4057_v55  ;;  %v1808_v4 = vrot.slane %v3861_v20, %v4574_v46 }
 0x360   :  { %3140 = vmatmul.mubr.msk.f32.vlgmr.msra.gmra.mrb[10].mxu0 %vm795_vm4, %v3263_v49  ;;  %v4051_v62 = vcvt.s32.f32 %v1941_v14  ;;  %v1830_v17 = vrot.slane %v4587_v27, %v4574_v46  ;;  %v2275_v45 = vrot.slane %v4584_v38, %v4065_v22  ;;  %v2293_v39 = vrot.slane %v3855_v60, %v4057_v55 }
 0x361   :  { %3197 = vmatpush1.bf16.msra.mxu0 %v3188_v51  ;;  %1535 = vmatprep.mubr.f32.mxu0 %v4578_v30  ;;  %v4053_v32 = vcvt.s32.f32 %v1942_v6  ;;  %v2281_v8 = vrot.slane %v2271_v44, %v4057_v55  ;;  %v2321_v9 = vrot.slane %v4585_v11, %v4065_v22  ;;  %v4089_v26 = vrot.slane %v2317_v33, %v4057_v55 }
 0x362   :  { %3139 = vmatmul.mubr.msk.f32.gmra.mrb[10].mxu1 %vm795_vm4, %v3264_v34  ;;  %4581 = vst [vmem:[#allocation16_spill] sm:$0xff] %v4051_v62  ;;  %v1945_v50 = vmul.f32 2.0, %v4051_v62  ;;  %v2312_v23 = vsub.f32 1.0, %v4051_v62  ;;  %v1814_v53 = vrot.slane %v1804_v41, %v4573_v37  ;;  %v1836_v56 = vrot.slane %v1826_v43, %v4573_v37 }
 0x363   :  { %1615 = vmatprep.mubr.f32.mxu1 %v4578_v30  ;;  %4582 = vst [vmem:[#allocation28_spill] sm:$0xff] %v4053_v32  ;;  %v1946_v48 = vmul.f32 2.0, %v4053_v32  ;;  %4588 = vst [vmem:[#allocation26_spill] sm:$0xff] %v4089_v26  ;;  %v1818_v49 = vrot.slane %v1808_v4, %v4573_v37  ;;  %v1840_v15 = vrot.slane %v1830_v17, %v4573_v37  ;;  %v2313_v44 = vsub.f32 1.0, %v4053_v32 }
 0x364   :  { %3141 = vmatmul.mubr.msk.f32.gmra.mrb[12].mxu0 %vm795_vm4, %v3264_v34  ;;  %v4060_v18 = vsub.f32 1.0, %v1945_v50  ;;  %v2343_v58 = vrot.slane %v3858_v16, %v4057_v55  ;;  %v2285_v54 = vrot.slane %v2275_v45, %v4057_v55  ;;  %v2297_v14 = vrot.slane %v3855_v60, %v4065_v22 }
 0x365   :  { %1692 = vmatprep.mubr.f32.mxu0 %v4578_v30  ;;  %v4069_v42 = vsub.f32 1.0, %v1946_v48  ;;  %v2303_v6 = vrot.slane %v2293_v39, %v4057_v55  ;;  %v4103_v50 = vrot.slane %v2321_v9, %v4057_v55  ;;  %v2347_v48 = vrot.slane %v3858_v16, %v4065_v22 }
 0x366   :  { %3144 = vmatmul.mubr.msk.f32.vlgmr.msra.gmra.mrb[12].mxu1 %vm795_vm4, %v4026_v0  ;;  %4583 = vst [vmem:[#allocation17_spill] sm:$0xff] %v4060_v18  ;;  %v2266_v40 = vmul.f32 0.70710677, %v4060_v18  ;;  %v1872_v33 = vrot.slane %v3864_v52, %v4573_v37  ;;  %v1876_v41 = vrot.slane %v3864_v52, %v4574_v46  ;;  %v2332_v43 = vmul.f32 %v4089_v26, %v2312_v23 }
 0x367   :  { %1621 = vmatprep.mubr.f32.mxu1 %v4578_v30  ;;  %4586 = vst [vmem:[#allocation23_spill] sm:$0xff] %v4069_v42  ;;  %v2267_v51 = vmul.f32 0.70710677, %v4069_v42  ;;  %4589 = vst [vmem:[#allocation29_spill] sm:$0xff] %v4103_v50  ;;  %v1819_v17 = vmul.f32 %v1814_v53, %v4576_v36  ;;  %v1820_v45 = vmul.f32 %v1818_v49, %v4576_v36 }
 0x368   :  { %3146 = vmatmul.mubr.msk.f32.vlgmr.msra.gmra.mrb[14].mxu0 %vm795_vm4, %v4026_v0  ;;  %v2286_v34 = vmul.f32 %v2281_v8, %v2266_v40  ;;  %v1821_v39 = vmul.f32 %v1814_v53, %v4577_v61  ;;  %v1822_v9 = vmul.f32 %v1818_v49, %v4577_v61  ;;  %v2353_v10 = vrot.slane %v2343_v58, %v4057_v55 }
 0x369   :  { %1698 = vmatprep.mubr.f32.mxu0 %v4578_v30  ;;  %v2288_v4 = vmul.f32 %v2281_v8, %v2267_v51  ;;  %v2287_v57 = vmul.f32 %v2285_v54, %v2266_v40  ;;  %v2307_v59 = vrot.slane %v2297_v14, %v4057_v55  ;;  %v2289_v3 = vmul.f32 %v2285_v54, %v2267_v51 }
 0x36a   :  { %3145 = vmatmul.mubr.msk.f32.gmra.mrb[14].mxu1 %vm795_vm4, %v4038_v19  ;;  %v2308_v32 = vadd.f32 %v2303_v6, %v2286_v34  ;;  %v4120_v46 = vmul.f32 %v4103_v50, %v2312_v23  ;;  %v2357_v8 = vrot.slane %v2347_v48, %v4057_v55  ;;  %v2334_v62 = vmul.f32 %v4089_v26, %v2313_v44 }
 0x36b   :  { %2013 = vmatprep.mubr.f32.mxu1 %v4578_v30  ;;  %v1882_v36 = vrot.slane %v1872_v33, %v4573_v37  ;;  %v1886_v53 = vrot.slane %v1876_v41, %v4573_v37  ;;  %v2310_v52 = vadd.f32 %v2303_v6, %v2288_v4  ;;  %v4127_v61 = vmul.f32 %v4103_v50, %v2313_v44 }
 0x36c   :  { %3147 = vmatmul.mubr.msk.f32.gmra.mrb[16].mxu0 %vm795_vm4, %v4038_v19  ;;  %v1841_v40 = vadd.f32 %v1836_v56, %v1819_v17  ;;  %v1842_v49 = vadd.f32 %v1840_v15, %v1820_v45  ;;  %v1843_v58 = vadd.f32 %v1836_v56, %v1821_v39  ;;  %v1844_v51 = vadd.f32 %v1840_v15, %v1822_v9 }
 0x36d   :  { %2090 = vmatprep.mubr.f32.mxu0 %v4578_v30  ;;  %v4130_v23 = vmul.f32 %v2353_v10, %v4060_v18  ;;  %v2309_v54 = vadd.f32 %v2307_v59, %v2287_v57  ;;  %v4133_v14 = vmul.f32 %v2353_v10, %v4069_v42  ;;  %v2311_v48 = vadd.f32 %v2307_v59, %v2289_v3 }
 0x36e   :  { %v4135_v6 = vadd.f32 %v2332_v43, %v2308_v32  ;;  %v4138_v44 = vmul.f32 %v2357_v8, %v4060_v18  ;;  %v4140_v4 = vadd.f32 %v2334_v62, %v2310_v52  ;;  %v4143_v17 = vmul.f32 %v2357_v8, %v4069_v42  ;;  %v4591_v32 = vld [vmem:[#allocation21_spill] sm:$0xff]  ;;  %v4593_v8 = vld [vmem:[#allocation30_spill] sm:$0xff] }
 0x36f   :  { %v4590_v57 = vsub.f32 %v3970_v12, %v3993_v28  ;;  %v1845_v43 = vmul.f32 %v3807_v13, %v4591_v32  ;;  %v4592_v39 = vsub.f32 %v3980_v25, %v3989_v35  ;;  %v4594_v25 = vsub.f32 %v3974_v1, %v3991_v5 }
 0x431   :  { %v1454_v34 = vpop.f32.mrb[8].mxu1 }
 0x432   :  { %v1861_v33 = vmul.f32 %v1841_v40, %v1454_v34  ;;  %v1923_v26 = vmul.f32 %v1882_v36, %v1454_v34  ;;  %v1456_v37 = vpop.f32.mrb[9].mxu1 }
 0x433   :  { %v1531_v41 = vpop.f32.mrb[10].mxu0  ;;  %v1862_v56 = vmul.f32 %v1842_v49, %v1456_v37  ;;  %v1924_v15 = vmul.f32 %v1886_v53, %v1456_v37  ;;  %v1846_v37 = vmul.f32 %v4593_v8, %v4591_v32 }
 0x434   :  { %v1865_v3 = vadd.f32 %v1861_v33, %v4590_v57  ;;  %v1887_v59 = vmul.f32 %v1882_v36, %v1531_v41  ;;  %v1915_v10 = vmul.f32 %v1841_v40, %v1531_v41  ;;  %v1533_v45 = vpop.f32.mrb[11].mxu0 }
 0x435   :  { %v1866_v9 = vadd.f32 %v1862_v56, %v4592_v39  ;;  %v1888_v34 = vmul.f32 %v1886_v53, %v1533_v45  ;;  %v1916_v52 = vmul.f32 %v1842_v49, %v1533_v45  ;;  %v1460_v62 = vpop.f32.mrb[10].mxu1 }
 0x436   :  { %v1891_v50 = vsub.f32 %v1865_v3, %v1887_v59  ;;  %v1919_v12 = vadd.f32 %v1915_v10, %v4003_v29  ;;  %v1863_v28 = vmul.f32 %v1843_v58, %v1460_v62  ;;  %v1925_v33 = vmul.f32 %v1882_v36, %v1460_v62  ;;  %v1462_v40 = vpop.f32.mrb[11].mxu1 }
 0x437   :  { %v1892_v41 = vsub.f32 %v1866_v9, %v1888_v34  ;;  %v1920_v57 = vadd.f32 %v1916_v52, %v4006_v31  ;;  %v1537_v42 = vpop.f32.mrb[12].mxu0  ;;  %v1864_v18 = vmul.f32 %v1844_v51, %v1462_v40  ;;  %v1926_v16 = vmul.f32 %v1886_v53, %v1462_v40  ;;  %v4596_v40 = vld [vmem:[#allocation25_spill] sm:$0xff] }
 0x438   :  { %v1867_v35 = vadd.f32 %v1863_v28, %v4594_v25  ;;  %v1889_v49 = vmul.f32 %v1882_v36, %v1537_v42  ;;  %v1917_v56 = vmul.f32 %v1843_v58, %v1537_v42  ;;  %v1539_v45 = vpop.f32.mrb[13].mxu0  ;;  %v1927_v32 = vadd.f32 %v1923_v26, %v1919_v12 }
 0x439   :  { %v4595_v29 = vsub.f32 %v3987_v47, %v4013_v21  ;;  %v1890_v59 = vmul.f32 %v1886_v53, %v1539_v45  ;;  %v1918_v10 = vmul.f32 %v1844_v51, %v1539_v45  ;;  %v1617_v39 = vpop.f32.mrb[12].mxu1  ;;  %v1928_v9 = vadd.f32 %v1924_v15, %v1920_v57 }
 0x43a   :  { %v1893_v31 = vsub.f32 %v1867_v35, %v1889_v49  ;;  %v1921_v34 = vadd.f32 %v1917_v56, %v4011_v7  ;;  %v1895_v52 = vmul.f32 %v1845_v43, %v1617_v39  ;;  %v1619_v62 = vpop.f32.mrb[13].mxu1  ;;  %v1847_v1 = vmul.f32 %v3807_v13, %v4596_v40 }
 0x43b   :  { %v1868_v3 = vadd.f32 %v1864_v18, %v4595_v29  ;;  %v1922_v42 = vadd.f32 %v1918_v10, %v4028_v24  ;;  %v1694_v26 = vpop.f32.mrb[14].mxu0  ;;  %v1896_v36 = vmul.f32 %v1846_v37, %v1619_v62  ;;  %v1848_v47 = vmul.f32 %v4593_v8, %v4596_v40 }
 0x43c   :  { %v1899_v21 = vadd.f32 %v1895_v52, %v1891_v50  ;;  %v1931_v18 = vmul.f32 %v1845_v43, %v1694_v26  ;;  %v2337_v53 = vadd.f32 %v4120_v46, %v2309_v54  ;;  %v1696_v58 = vpop.f32.mrb[15].mxu0  ;;  %v1929_v51 = vadd.f32 %v1925_v33, %v1921_v34 }
 0x43d   :  { %v1894_v5 = vsub.f32 %v1868_v3, %v1890_v59  ;;  %v1900_v7 = vadd.f32 %v1896_v36, %v1892_v41  ;;  %v1932_v15 = vmul.f32 %v1846_v37, %v1696_v58  ;;  %v1623_v12 = vpop.f32.mrb[14].mxu1  ;;  %v2339_v28 = vadd.f32 %v4127_v61, %v2311_v48 }
 0x43e   :  { %v1930_v13 = vadd.f32 %v1926_v16, %v1922_v42  ;;  %v4172_v57 = vmul.f32 %v4135_v6, %v1899_v21  ;;  %v2468_v24 = vmul.f32 %v4130_v23, %v1899_v21  ;;  %v1935_v25 = vadd.f32 %v1931_v18, %v1927_v32  ;;  %v1625_v8 = vpop.f32.mrb[15].mxu1 }
 0x43f   :  { %v1897_v35 = vmul.f32 %v1847_v1, %v1623_v12  ;;  %v4175_v50 = vmul.f32 %v2337_v53, %v1900_v7  ;;  %v2469_v46 = vmul.f32 %v4138_v44, %v1900_v7  ;;  %v1936_v54 = vadd.f32 %v1932_v15, %v1928_v9  ;;  %v1700_v43 = vpop.f32.mrb[16].mxu0 }
 0x440   :  { %v1898_v33 = vmul.f32 %v1848_v47, %v1625_v8  ;;  %v4179_v37 = vmul.f32 %v4130_v23, %v1935_v25  ;;  %v2464_v16 = vmul.f32 %v4135_v6, %v1935_v25  ;;  %v1933_v48 = vmul.f32 %v1847_v1, %v1700_v43  ;;  %v1702_v41 = vpop.f32.mrb[17].mxu0 }
 0x441   :  { %v1901_v61 = vadd.f32 %v1897_v35, %v1893_v31  ;;  %v4183_v49 = vmul.f32 %v4138_v44, %v1936_v54  ;;  %v2465_v56 = vmul.f32 %v2337_v53, %v1936_v54  ;;  %v1934_v32 = vmul.f32 %v1848_v47, %v1702_v41  ;;  %v4227_v47 = vld [vmem:[%s4499_s8 + $0x30] sm:$0xff] }
 0x442   :  { %v1902_v45 = vadd.f32 %v1898_v33, %v1894_v5  ;;  %v1937_v10 = vadd.f32 %v1933_v48, %v1929_v51  ;;  %v2418_v52 = vsub.f32 %v4172_v57, %v4179_v37  ;;  %v4201_v5 = vadd.f32 %v2468_v24, %v2464_v16 }
 0x443   :  { %v3200_v29 = vpack.c.bf16 %v1901_v61, %v1899_v21  ;;  %v4186_v3 = vmul.f32 %v4140_v4, %v1901_v61  ;;  %v2470_v59 = vmul.f32 %v4133_v14, %v1901_v61  ;;  %v1938_v39 = vadd.f32 %v1934_v32, %v1930_v13 }
 0x444   :  { %v4189_v23 = vmul.f32 %v2339_v28, %v1902_v45  ;;  %v2471_v6 = vmul.f32 %v4143_v17, %v1902_v45  ;;  %v3198_v9 = vpack.c.bf16 %v1902_v45, %v1900_v7  ;;  %v3204_v31 = vpack.c.bf16 %v1937_v10, %v1935_v25 }
 0x445   :  { %v4193_v44 = vmul.f32 %v4133_v14, %v1937_v10  ;;  %v2466_v34 = vmul.f32 %v4140_v4, %v1937_v10  ;;  %v4199_v62 = vmul.f32 %v4143_v17, %v1938_v39  ;;  %v2467_v40 = vmul.f32 %v2339_v28, %v1938_v39 }
 0x446   :  { %3199 = vmatprep.subr.bf16.mxu1 %v3198_v9  ;;  %v3202_v1 = vpack.c.bf16 %v1938_v39, %v1936_v54  ;;  %v2419_v42 = vsub.f32 %v4175_v50, %v4183_v49  ;;  %v4205_v26 = vadd.f32 %v2469_v46, %v2465_v56  ;;  %v2501_v21 = vand.u32 1, %v4580_v63 }
 0x447   :  { %3201 = vmatpush1.bf16.msra.mxu1 %v3200_v29  ;;  %v4209_v4 = vadd.f32 %v2470_v59, %v2466_v34  ;;  %v4213_v36 = vadd.f32 %v2471_v6, %v2467_v40  ;;  %v4257_v51 = vsub.s32 3, %v4579_v2  ;;  %v4260_v7 = vsub.s32 7, %v4579_v2  ;;  %v4601_v40 = vld [vmem:[#allocation32_spill] sm:$0xff] }
 0x448   :  { %3203 = vmatprep.subr.bf16.mxu0 %v3202_v1  ;;  %3207 = vmatprep.subr.bf16.mxu1 %v3198_v9  ;;  %v4253_v53 = vcvt.s32.f32 %v2501_v21  ;;  %v2365_v13 = vrot.slane %v3861_v20, %v4057_v55  ;;  %v2387_v24 = vrot.slane %v4587_v27, %v4057_v55  ;;  %v2391_v25 = vrot.slane %v4587_v27, %v4065_v22 }
 0x449   :  { %3205 = vmatpush1.bf16.msra.mxu0 %v3204_v31  ;;  %v2821_v28 = vrot.slane %v4584_v38, %v4257_v51  ;;  %v2825_v63 = vrot.slane %v4584_v38, %v4260_v7  ;;  %v2867_v35 = vrot.slane %v4585_v11, %v4257_v51  ;;  %v2871_v43 = vrot.slane %v4585_v11, %v4260_v7  ;;  %v4598_v11 = vld [vmem:[#allocation31_spill] sm:$0xff] }
 0x44a   :  { %3211 = vmatprep.subr.bf16.mxu0 %v3202_v1  ;;  %3148 = vmatmul.mubr.msk.f32.vlgmr.msra.gmra.mrb[16].mxu1 %vm795_vm4, %v4026_v0  ;;  %4597 = vst [vmem:[#allocation24_spill] sm:$0xff] %v4253_v53  ;;  %v2505_v15 = vmul.f32 2.0, %v4253_v53  ;;  %v2375_v33 = vrot.slane %v2365_v13, %v4057_v55  ;;  %v2843_v16 = vrot.slane %v3855_v60, %v4257_v51  ;;  %v2863_v9 = vsub.f32 1.0, %v4253_v53 }
 0x44b   :  { %3209 = vmatpush1.bf16.msra.mxu1 %v3200_v29  ;;  %2019 = vmatprep.mubr.f32.mxu1 %v4578_v30  ;;  %v2831_v38 = vrot.slane %v2821_v28, %v4257_v51  ;;  %v2835_v54 = vrot.slane %v2825_v63, %v4257_v51  ;;  %v2847_v61 = vrot.slane %v3855_v60, %v4260_v7  ;;  %v4602_v28 = vld [vmem:[#allocation23_spill] sm:$0xff] }
 0x44c   :  { %3150 = vmatmul.mubr.msk.f32.vlgmr.msra.gmra.mrb[18].mxu0 %vm795_vm4, %v4026_v0  ;;  %v4238_v0 = vld [vmem:[%s4499_s8 + $0x38] sm:$0xff]  ;;  %v4279_v8 = vsub.f32 1.0, %v2505_v15  ;;  %v2397_v48 = vrot.slane %v2387_v24, %v4057_v55  ;;  %v2401_v56 = vrot.slane %v2391_v25, %v4057_v55  ;;  %v4296_v32 = vrot.slane %v2867_v35, %v4257_v51 }
 0x44d   :  { %3213 = vmatpush1.bf16.msra.mxu0 %v3204_v31  ;;  %2096 = vmatprep.mubr.f32.mxu0 %v4578_v30  ;;  %v2893_v29 = vrot.slane %v4598_v11, %v4257_v51  ;;  %v2897_v59 = vrot.slane %v4598_v11, %v4260_v7  ;;  %v4304_v39 = vrot.slane %v2871_v43, %v4257_v51  ;;  %v4600_v31 = vld [vmem:[#allocation17_spill] sm:$0xff] }
 0x44e   :  { %3149 = vmatmul.mubr.msk.f32.gmra.mrb[18].mxu1 %vm795_vm4, %v4038_v19  ;;  %v2817_v10 = vmul.f32 0.70710677, %v4279_v8  ;;  %v2380_v34 = vmul.f32 %v2375_v33, %v4600_v31  ;;  %v2433_v1 = vrot.slane %v4601_v40, %v4057_v55  ;;  %v2857_v21 = vrot.slane %v2847_v61, %v4257_v51 }
 0x44f   :  { %2176 = vmatprep.mubr.f32.mxu1 %v4578_v30  ;;  %4599 = vst [vmem:[#allocation27_spill] sm:$0xff] %v4304_v39  ;;  %v2437_v15 = vrot.slane %v4601_v40, %v4065_v22  ;;  %v2382_v63 = vmul.f32 %v2375_v33, %v4602_v28  ;;  %v2907_v25 = vrot.slane %v2897_v59, %v4257_v51 }
 0x450   :  { %3151 = vmatmul.mubr.msk.f32.gmra.mrb[20].mxu0 %vm795_vm4, %v4038_v19  ;;  %v2500_v19 = vand.u32 1, %v4579_v2  ;;  %v2369_v2 = vrot.slane %v3861_v20, %v4065_v22  ;;  %v2838_v35 = vmul.f32 %v2831_v38, %v2817_v10  ;;  %v4322_v43 = vmul.f32 %v4296_v32, %v2863_v9 }
 0x451   :  { %2253 = vmatprep.mubr.f32.mxu0 %v4578_v30  ;;  %v4325_v61 = vmul.f32 %v4304_v39, %v2863_v9  ;;  %v2402_v22 = vadd.f32 %v2397_v48, %v2380_v34  ;;  %v2443_v33 = vrot.slane %v2433_v1, %v4057_v55  ;;  %v4339_v1 = vmul.f32 %v2907_v25, %v4279_v8 }
 0x452   :  { %3154 = vmatmul.mubr.msk.f32.vlgmr.msra.gmra.mrb[20].mxu1 %vm795_vm4, %v4227_v47  ;;  %v4251_v18 = vcvt.s32.f32 %v2500_v19  ;;  %v2379_v41 = vrot.slane %v2369_v2, %v4057_v55  ;;  %v2853_v19 = vrot.slane %v2843_v16, %v4257_v51  ;;  %v2903_v2 = vrot.slane %v2893_v29, %v4257_v51 }
 0x453   :  { %2182 = vmatprep.mubr.f32.mxu1 %v4578_v30  ;;  %v2839_v16 = vmul.f32 %v2835_v54, %v2817_v10  ;;  %v2447_v29 = vrot.slane %v2437_v15, %v4057_v55  ;;  %v4606_v50 = vsub.f32 %v4186_v3, %v4193_v44 }
 0x454   :  { %3156 = vmatmul.mubr.msk.f32.vlgmr.msra.gmra.mrb[22].mxu0 %vm795_vm4, %v4227_v47  ;;  %v2504_v58 = vmul.f32 2.0, %v4251_v18  ;;  %v2862_v45 = vsub.f32 1.0, %v4251_v18  ;;  %v2383_v13 = vmul.f32 %v2379_v41, %v4602_v28  ;;  %v2404_v28 = vadd.f32 %v2397_v48, %v2382_v63 }
 0x455   :  { %2259 = vmatprep.mubr.f32.mxu0 %v4578_v30  ;;  %v4336_v10 = vmul.f32 %v2903_v2, %v4279_v8 }
 0x456   :  { %3155 = vmatmul.mubr.msk.f32.gmra.mrb[22].mxu1 %vm795_vm4, %v4238_v0  ;;  %v4263_v12 = vsub.f32 1.0, %v2504_v58  ;;  %v2381_v58 = vmul.f32 %v2379_v41, %v4600_v31  ;;  %v2882_v24 = vmul.f32 %v4296_v32, %v2862_v45  ;;  %v2405_v59 = vadd.f32 %v2401_v56, %v2383_v13 }
 0x457   :  { %2572 = vmatprep.mubr.f32.mxu1 %v4578_v30 }
 0x458   :  { %3157 = vmatmul.mubr.msk.f32.gmra.mrb[24].mxu0 %vm795_vm4, %v4238_v0  ;;  %v2816_v46 = vmul.f32 0.70710677, %v4263_v12  ;;  %v2403_v31 = vadd.f32 %v2401_v56, %v2381_v58  ;;  %v4333_v17 = vmul.f32 %v2907_v25, %v4263_v12 }
 0x459   :  { %2649 = vmatprep.mubr.f32.mxu0 %v4578_v30 }
 0x45a   :  { %v2836_v60 = vmul.f32 %v2831_v38, %v2816_v46  ;;  %v2837_v6 = vmul.f32 %v2835_v54, %v2816_v46  ;;  %v2883_v46 = vmul.f32 %v4304_v39, %v2862_v45  ;;  %v4330_v45 = vmul.f32 %v2903_v2, %v4263_v12 }
 0x45b   :  { %v2860_v54 = vadd.f32 %v2853_v19, %v2838_v35  ;;  %v4603_v35 = vld [vmem:[#allocation16_spill] sm:$0xff] }
 0x45c   :  { %v2858_v41 = vadd.f32 %v2853_v19, %v2836_v60  ;;  %v2859_v11 = vadd.f32 %v2857_v21, %v2837_v6  ;;  %v2861_v6 = vadd.f32 %v2857_v21, %v2839_v16 }
 0x45e   :  { %v4341_v58 = vadd.f32 %v2882_v24, %v2858_v41  ;;  %v4343_v15 = vadd.f32 %v2883_v46, %v2859_v11  ;;  %v4605_v46 = vld [vmem:[#allocation29_spill] sm:$0xff] }
 0x45f   :  { %v2407_v41 = vmul.f32 %v4605_v46, %v4603_v35 }
 0x51d   :  { %v2015_v38 = vpop.f32.mrb[16].mxu1 }
 0x51e   :  { %v2422_v9 = vmul.f32 %v2402_v22, %v2015_v38  ;;  %v2484_v34 = vmul.f32 %v2443_v33, %v2015_v38  ;;  %v2017_v60 = vpop.f32.mrb[17].mxu1  ;;  %v4604_v38 = vld [vmem:[#allocation26_spill] sm:$0xff] }
 0x51f   :  { %v2092_v55 = vpop.f32.mrb[18].mxu0  ;;  %v2423_v48 = vmul.f32 %v2403_v31, %v2017_v60  ;;  %v2485_v56 = vmul.f32 %v2447_v29, %v2017_v60  ;;  %v2406_v21 = vmul.f32 %v4604_v38, %v4603_v35 }
 0x520   :  { %v2426_v19 = vadd.f32 %v2422_v9, %v2418_v52  ;;  %v2448_v63 = vmul.f32 %v2443_v33, %v2092_v55  ;;  %v2476_v13 = vmul.f32 %v2402_v22, %v2092_v55  ;;  %v2094_v2 = vpop.f32.mrb[19].mxu0 }
 0x521   :  { %v2427_v25 = vadd.f32 %v2423_v48, %v2419_v42  ;;  %v2449_v16 = vmul.f32 %v2447_v29, %v2094_v2  ;;  %v2477_v60 = vmul.f32 %v2403_v31, %v2094_v2  ;;  %v2021_v24 = vpop.f32.mrb[18].mxu1 }
 0x522   :  { %v2452_v11 = vsub.f32 %v2426_v19, %v2448_v63  ;;  %v2480_v57 = vadd.f32 %v2476_v13, %v4201_v5  ;;  %v2424_v37 = vmul.f32 %v2404_v28, %v2021_v24  ;;  %v2486_v52 = vmul.f32 %v2443_v33, %v2021_v24  ;;  %v2023_v22 = vpop.f32.mrb[19].mxu1 }
 0x523   :  { %v2453_v9 = vsub.f32 %v2427_v25, %v2449_v16  ;;  %v2481_v55 = vadd.f32 %v2477_v60, %v4205_v26  ;;  %v2098_v14 = vpop.f32.mrb[20].mxu0  ;;  %v2425_v53 = vmul.f32 %v2405_v59, %v2023_v22  ;;  %v2487_v39 = vmul.f32 %v2447_v29, %v2023_v22  ;;  %v4608_v22 = vld [vmem:[#allocation28_spill] sm:$0xff] }
 0x524   :  { %v2428_v49 = vadd.f32 %v2424_v37, %v4606_v50  ;;  %v2450_v42 = vmul.f32 %v2443_v33, %v2098_v14  ;;  %v2478_v31 = vmul.f32 %v2404_v28, %v2098_v14  ;;  %v2100_v48 = vpop.f32.mrb[21].mxu0  ;;  %v2488_v2 = vadd.f32 %v2484_v34, %v2480_v57 }
 0x525   :  { %v4607_v5 = vsub.f32 %v4189_v23, %v4199_v62  ;;  %v2451_v63 = vmul.f32 %v2447_v29, %v2100_v48  ;;  %v2479_v13 = vmul.f32 %v2405_v59, %v2100_v48  ;;  %v2178_v35 = vpop.f32.mrb[20].mxu1  ;;  %v2489_v25 = vadd.f32 %v2485_v56, %v2481_v55 }
 0x526   :  { %v2454_v26 = vsub.f32 %v2428_v49, %v2450_v42  ;;  %v2482_v16 = vadd.f32 %v2478_v31, %v4209_v4  ;;  %v2456_v60 = vmul.f32 %v2406_v21, %v2178_v35  ;;  %v2180_v24 = vpop.f32.mrb[21].mxu1  ;;  %v2408_v3 = vmul.f32 %v4604_v38, %v4608_v22 }
 0x527   :  { %v2429_v19 = vadd.f32 %v2425_v53, %v4607_v5  ;;  %v2483_v14 = vadd.f32 %v2479_v13, %v4213_v36  ;;  %v2255_v33 = vpop.f32.mrb[22].mxu0  ;;  %v2457_v28 = vmul.f32 %v2407_v41, %v2180_v24  ;;  %v2409_v23 = vmul.f32 %v4605_v46, %v4608_v22 }
 0x528   :  { %v2460_v62 = vadd.f32 %v2456_v60, %v2452_v11  ;;  %v2492_v53 = vmul.f32 %v2406_v21, %v2255_v33  ;;  %v2257_v29 = vpop.f32.mrb[23].mxu0  ;;  %v2888_v59 = vadd.f32 %v4322_v43, %v2860_v54  ;;  %v2490_v34 = vadd.f32 %v2486_v52, %v2482_v16 }
 0x529   :  { %v2455_v44 = vsub.f32 %v2429_v19, %v2451_v63  ;;  %v2461_v4 = vadd.f32 %v2457_v28, %v2453_v9  ;;  %v2493_v56 = vmul.f32 %v2407_v41, %v2257_v29  ;;  %v2184_v57 = vpop.f32.mrb[22].mxu1  ;;  %v2889_v37 = vadd.f32 %v4325_v61, %v2861_v6 }
 0x52a   :  { %v2491_v38 = vadd.f32 %v2487_v39, %v2483_v14  ;;  %v4372_v55 = vmul.f32 %v4341_v58, %v2460_v62  ;;  %v3018_v36 = vmul.f32 %v4330_v45, %v2460_v62  ;;  %v2496_v50 = vadd.f32 %v2492_v53, %v2488_v2  ;;  %v2186_v46 = vpop.f32.mrb[23].mxu1 }
 0x52b   :  { %v2458_v49 = vmul.f32 %v2408_v3, %v2184_v57  ;;  %v4376_v21 = vmul.f32 %v4343_v15, %v2461_v4  ;;  %v3019_v43 = vmul.f32 %v4333_v17, %v2461_v4  ;;  %v2497_v54 = vadd.f32 %v2493_v56, %v2489_v25  ;;  %v2261_v11 = vpop.f32.mrb[24].mxu0 }
 0x52c   :  { %v2459_v41 = vmul.f32 %v2409_v23, %v2186_v46  ;;  %v4380_v52 = vmul.f32 %v4330_v45, %v2496_v50  ;;  %v3014_v39 = vmul.f32 %v4341_v58, %v2496_v50  ;;  %v2494_v6 = vmul.f32 %v2408_v3, %v2261_v11  ;;  %v2263_v9 = vpop.f32.mrb[25].mxu0 }
 0x52d   :  { %v2462_v61 = vadd.f32 %v2458_v49, %v2454_v26  ;;  %v4384_v42 = vmul.f32 %v4333_v17, %v2497_v54  ;;  %v3015_v31 = vmul.f32 %v4343_v15, %v2497_v54  ;;  %v2495_v2 = vmul.f32 %v2409_v23, %v2263_v9  ;;  %v3265_v23 = vld [vmem:[%s4499_s8] sm:$0xff] }
 0x52e   :  { %v2463_v48 = vadd.f32 %v2459_v41, %v2455_v44  ;;  %v2498_v13 = vadd.f32 %v2494_v6, %v2490_v34  ;;  %v2968_v15 = vsub.f32 %v4372_v55, %v4380_v52  ;;  %v4401_v3 = vadd.f32 %v3018_v36, %v3014_v39 }
 0x52f   :  { %v3216_v5 = vpack.c.bf16 %v2462_v61, %v2460_v62  ;;  %v4387_v19 = vmul.f32 %v2888_v59, %v2462_v61  ;;  %v3020_v63 = vmul.f32 %v4336_v10, %v2462_v61  ;;  %v2499_v35 = vadd.f32 %v2495_v2, %v2491_v38 }
 0x530   :  { %v4390_v45 = vmul.f32 %v2889_v37, %v2463_v48  ;;  %v3021_v58 = vmul.f32 %v4339_v1, %v2463_v48  ;;  %v3214_v25 = vpack.c.bf16 %v2463_v48, %v2461_v4  ;;  %v3220_v26 = vpack.c.bf16 %v2498_v13, %v2496_v50 }
 0x531   :  { %v4394_v17 = vmul.f32 %v4336_v10, %v2498_v13  ;;  %v3016_v16 = vmul.f32 %v2888_v59, %v2498_v13  ;;  %v4399_v60 = vmul.f32 %v4339_v1, %v2499_v35  ;;  %v3017_v24 = vmul.f32 %v2889_v37, %v2499_v35 }
 0x532   :  { %3215 = vmatprep.subr.bf16.mxu1 %v3214_v25  ;;  %v3218_v22 = vpack.c.bf16 %v2499_v35, %v2497_v54  ;;  %v2969_v44 = vsub.f32 %v4376_v21, %v4384_v42  ;;  %v4405_v14 = vadd.f32 %v3019_v43, %v3015_v31  ;;  %v2919_v62 = vrot.slane %v3861_v20, %v4260_v7 }
 0x533   :  { %3217 = vmatpush1.bf16.msra.mxu1 %v3216_v5  ;;  %v2970_v10 = vsub.f32 %v4387_v19, %v4394_v17  ;;  %v4409_v33 = vadd.f32 %v3020_v63, %v3016_v16  ;;  %v2971_v1 = vsub.f32 %v4390_v45, %v4399_v60  ;;  %v4413_v28 = vadd.f32 %v3021_v58, %v3017_v24 }
 0x534   :  { %3219 = vmatprep.subr.bf16.mxu0 %v3218_v22  ;;  %3223 = vmatprep.subr.bf16.mxu1 %v3214_v25  ;;  %v2937_v29 = vrot.slane %v4587_v27, %v4257_v51  ;;  %v2941_v59 = vrot.slane %v4587_v27, %v4260_v7  ;;  %v2983_v56 = vrot.slane %v4601_v40, %v4257_v51 }
 0x535   :  { %3221 = vmatpush1.bf16.msra.mxu0 %v3220_v26  ;;  %v2987_v37 = vrot.slane %v4601_v40, %v4260_v7 }
 0x536   :  { %3227 = vmatprep.subr.bf16.mxu0 %v3218_v22  ;;  %3158 = vmatmul.mubr.msk.f32.vlgmr.msra.gmra.mrb[24].mxu1 %vm795_vm4, %v4227_v47  ;;  %v2947_v4 = vrot.slane %v2937_v29, %v4257_v51  ;;  %v2993_v27 = vrot.slane %v2983_v56, %v4257_v51 }
 0x537   :  { %3225 = vmatpush1.bf16.msra.mxu1 %v3216_v5  ;;  %2578 = vmatprep.mubr.f32.mxu1 %v4578_v30  ;;  %v2997_v46 = vrot.slane %v2987_v37, %v4257_v51 }
 0x538   :  { %3160 = vmatmul.mubr.msk.f32.vlgmr.msra.gmra.mrb[26].mxu0 %vm795_vm4, %v4227_v47  ;;  %v3266_v47 = vld [vmem:[%s4499_s8 + $0x8] sm:$0xff]  ;;  %s3398_s8 = smov [#allocation10]  }
 0x539   :  { %3229 = vmatpush1.bf16.msra.mxu0 %v3220_v26  ;;  %2655 = vmatprep.mubr.f32.mxu0 %v4578_v30  ;;  %s3086_s14 = sshll.u32 %s3398_s8, 4  ;;  %s3087_s14 = int_to_ptr.vmem [resolvable:$true] %s3086_s14 }
 0x53a   :  { %3159 = vmatmul.mubr.msk.f32.gmra.mrb[26].mxu1 %vm795_vm4, %v4238_v0  ;;  %s3355_s15 = scalar_lea.vmem %s3087_s14, 16  ;;  %s3359_s16 = scalar_lea.vmem %s3087_s14, 32 }
 0x53b   :  { %2726 = vmatprep.mubr.f32.mxu1 %v4578_v30  ;;  %p3356_p4 = scmp.ne.s32.totalorder %s3087_s14, %s3355_s15  ;;  %p3360_p5 = scmp.lt.s32.totalorder %s3087_s14, %s3087_s14 }
 0x53c   :  { %3161 = vmatmul.mubr.msk.f32.gmra.mrb[28].mxu0 %vm795_vm4, %v4238_v0  ;;  %v2915_v0 = vrot.slane %v3861_v20, %v4257_v51  ;;  %v2951_v20 = vrot.slane %v2941_v59, %v4257_v51  ;;  %p3361_p6 = scmp.lt.s32.totalorder %s3359_s16, %s3355_s15 }
 0x53d   :  { %2803 = vmatprep.mubr.f32.mxu0 %v4578_v30 }
 0x53e   :  { %3162 = vmatmul.mubr.msk.f32.vlgmr.msra.gmra.mrb[28].mxu1 %vm795_vm4, %v3265_v23  ;;  %v2925_v53 = vrot.slane %v2915_v0, %v4257_v51  ;;  %p3362_p7 = por %p3361_p6, %p3360_p5 }
 0x53f   :  { %2732 = vmatprep.mubr.f32.mxu1 %v4578_v30 }
 0x540   :  { %3164 = vmatmul.mubr.msk.f32.vlgmr.msra.gmra.mrb[30].mxu0 %vm795_vm4, %v3265_v23  ;;  %v2930_v34 = vmul.f32 %v2925_v53, %v4263_v12  ;;  %v2932_v38 = vmul.f32 %v2925_v53, %v4279_v8  ;;  %p3363_p8 = pnand %p3362_p7, %p3356_p4 }
 0x541   :  { %2809 = vmatprep.mubr.f32.mxu0 %v4578_v30  ;;  %v2929_v30 = vrot.slane %v2919_v62, %v4257_v51  ;;  %v4609_v51 = vld [vmem:[#allocation27_spill] sm:$0xff] }
 0x542   :  { %3163 = vmatmul.mubr.msk.f32.gmra.mrb[30].mxu1 %vm795_vm4, %v3266_v47  ;;  %v2952_v36 = vadd.f32 %v2947_v4, %v2930_v34  ;;  %v2954_v52 = vadd.f32 %v2947_v4, %v2932_v38  ;;  %v2957_v2 = vmul.f32 %v4609_v51, %v4251_v18  ;;  %v4610_v4 = vld [vmem:[#allocation24_spill] sm:$0xff] }
 0x543   :  { %v2931_v57 = vmul.f32 %v2929_v30, %v4263_v12  ;;  %v2933_v55 = vmul.f32 %v2929_v30, %v4279_v8  ;;  %v2956_v8 = vmul.f32 %v4296_v32, %v4251_v18  ;;  %v2958_v19 = vmul.f32 %v4296_v32, %v4610_v4 }
 0x544   :  { %3165 = vmatmul.mubr.msk.f32.gmra.mrb[32].mxu0 %vm795_vm4, %v3266_v47  ;;  %v2959_v45 = vmul.f32 %v4609_v51, %v4610_v4 }
 0x545   :  { %v2953_v49 = vadd.f32 %v2951_v20, %v2931_v57  ;;  %v2955_v39 = vadd.f32 %v2951_v20, %v2933_v55 }
 0x609   :  { %v2574_v50 = vpop.f32.mrb[24].mxu1 }
 0x60a   :  { %v2972_v21 = vmul.f32 %v2952_v36, %v2574_v50  ;;  %v3034_v43 = vmul.f32 %v2993_v27, %v2574_v50  ;;  %v2576_v54 = vpop.f32.mrb[25].mxu1 }
 0x60b   :  { %v2651_v12 = vpop.f32.mrb[26].mxu0  ;;  %v2973_v11 = vmul.f32 %v2953_v49, %v2576_v54  ;;  %v3035_v41 = vmul.f32 %v2997_v46, %v2576_v54 }
 0x60c   :  { %v2976_v7 = vadd.f32 %v2972_v21, %v2968_v15  ;;  %v2998_v40 = vmul.f32 %v2993_v27, %v2651_v12  ;;  %v3026_v61 = vmul.f32 %v2952_v36, %v2651_v12  ;;  %v2653_v6 = vpop.f32.mrb[27].mxu0 }
 0x60d   :  { %v2977_v9 = vadd.f32 %v2973_v11, %v2969_v44  ;;  %v2999_v42 = vmul.f32 %v2997_v46, %v2653_v6  ;;  %v3027_v31 = vmul.f32 %v2953_v49, %v2653_v6  ;;  %v2580_v48 = vpop.f32.mrb[26].mxu1 }
 0x60e   :  { %v3002_v5 = vsub.f32 %v2976_v7, %v2998_v40  ;;  %v3030_v63 = vadd.f32 %v3026_v61, %v4401_v3  ;;  %v2974_v13 = vmul.f32 %v2954_v52, %v2580_v48  ;;  %v3036_v58 = vmul.f32 %v2993_v27, %v2580_v48  ;;  %v2582_v35 = vpop.f32.mrb[27].mxu1 }
 0x60f   :  { %v3003_v25 = vsub.f32 %v2977_v9, %v2999_v42  ;;  %v3031_v26 = vadd.f32 %v3027_v31, %v4405_v14  ;;  %v2657_v16 = vpop.f32.mrb[28].mxu0  ;;  %v2975_v15 = vmul.f32 %v2955_v39, %v2582_v35  ;;  %v3037_v24 = vmul.f32 %v2997_v46, %v2582_v35 }
 0x610   :  { %v2978_v22 = vadd.f32 %v2974_v13, %v2970_v10  ;;  %v3000_v44 = vmul.f32 %v2993_v27, %v2657_v16  ;;  %v3028_v23 = vmul.f32 %v2954_v52, %v2657_v16  ;;  %v2659_v47 = vpop.f32.mrb[29].mxu0  ;;  %v3038_v18 = vadd.f32 %v3034_v43, %v3030_v63 }
 0x611   :  { %v2979_v3 = vadd.f32 %v2975_v15, %v2971_v1  ;;  %v3001_v0 = vmul.f32 %v2997_v46, %v2659_v47  ;;  %v3029_v62 = vmul.f32 %v2955_v39, %v2659_v47  ;;  %v2728_v53 = vpop.f32.mrb[28].mxu1  ;;  %v3039_v29 = vadd.f32 %v3035_v41, %v3031_v26 }
 0x612   :  { %v3004_v14 = vsub.f32 %v2978_v22, %v3000_v44  ;;  %v3032_v30 = vadd.f32 %v3028_v23, %v4409_v33  ;;  %v3006_v59 = vmul.f32 %v2956_v8, %v2728_v53  ;;  %v2730_v34 = vpop.f32.mrb[29].mxu1 }
 0x613   :  { %v3005_v17 = vsub.f32 %v2979_v3, %v3001_v0  ;;  %v3033_v10 = vadd.f32 %v3029_v62, %v4413_v28  ;;  %v2805_v56 = vpop.f32.mrb[30].mxu0  ;;  %v3007_v57 = vmul.f32 %v2957_v2, %v2730_v34 }
 0x614   :  { %v3010_v60 = vadd.f32 %v3006_v59, %v3002_v5  ;;  %v3042_v1 = vmul.f32 %v2956_v8, %v2805_v56  ;;  %v2807_v20 = vpop.f32.mrb[31].mxu0  ;;  %v3040_v37 = vadd.f32 %v3036_v58, %v3032_v30 }
 0x615   :  { %v3011_v38 = vadd.f32 %v3007_v57, %v3003_v25  ;;  %v3043_v55 = vmul.f32 %v2957_v2, %v2807_v20  ;;  %v2734_v33 = vpop.f32.mrb[30].mxu1  ;;  %v3041_v36 = vadd.f32 %v3037_v24, %v3033_v10 }
 0x616   :  { %v3046_v27 = vadd.f32 %v3042_v1, %v3038_v18  ;;  %v3008_v50 = vmul.f32 %v2958_v19, %v2734_v33  ;;  %v2736_v49 = vpop.f32.mrb[31].mxu1 }
 0x617   :  { %v3050_v32 = vmul.f32 %v3011_v38, %v3010_v60  ;;  %v3047_v46 = vadd.f32 %v3043_v55, %v3039_v29  ;;  %v2811_v21 = vpop.f32.mrb[32].mxu0  ;;  %v3009_v28 = vmul.f32 %v2959_v45, %v2736_v49 }
 0x618   :  { %v3063_v43 = vmul.f32 %v3046_v27, %v3011_v38  ;;  %v3012_v54 = vadd.f32 %v3008_v50, %v3004_v14  ;;  %v3044_v12 = vmul.f32 %v2958_v19, %v2811_v21  ;;  %v2813_v11 = vpop.f32.mrb[33].mxu0 }
 0x619   :  { %v3052_v41 = vmul.f32 %v3047_v46, %v3046_v27  ;;  %v3065_v52 = vmul.f32 %v3047_v46, %v3010_v60  ;;  %v3013_v39 = vadd.f32 %v3009_v28, %v3005_v17  ;;  %v3045_v7 = vmul.f32 %v2959_v45, %v2813_v11 }
 0x61a   :  { %v3048_v40 = vadd.f32 %v3044_v12, %v3040_v37 }
 0x61b   :  { %v3054_v61 = vadd.f32 %v3052_v41, %v3050_v32  ;;  %v3067_v6 = vsub.f32 %v3063_v43, %v3065_v52  ;;  %v3051_v8 = vmul.f32 %v3013_v39, %v3012_v54  ;;  %v3049_v9 = vadd.f32 %v3045_v7, %v3041_v36 }
 0x61c   :  { %v3064_v42 = vmul.f32 %v3048_v40, %v3013_v39 }
 0x61d   :  { %v3053_v31 = vmul.f32 %v3049_v9, %v3048_v40  ;;  %v3066_v48 = vmul.f32 %v3049_v9, %v3012_v54 }
 0x61f   :  { %v3055_v51 = vadd.f32 %v3053_v31, %v3051_v8  ;;  %v3068_v2 = vsub.f32 %v3064_v42, %v3066_v48 }
 0x621   :  { %v3056_v5 = vadd.f32 %v3055_v51, %v3054_v61  ;;  %v3069_v63 = vadd.f32 %v3068_v2, %v3067_v6 }
 0x623   :  { %v3057_v13 = vrot.slane %v3056_v5, 4  ;;  %v3070_v58 = vrot.slane %v3069_v63, 4 }
 0x625   :  { %v3058_v35 = vadd.f32 %v3057_v13, %v3056_v5  ;;  %v3071_v25 = vadd.f32 %v3070_v58, %v3069_v63 }
 0x627   :  { %v3059_v26 = vrot.slane %v3058_v35, 2  ;;  %v3072_v16 = vrot.slane %v3071_v25, 2 }
 0x629   :  { %v3060_v15 = vadd.f32 %v3059_v26, %v3058_v35  ;;  %v3073_v24 = vadd.f32 %v3072_v16, %v3071_v25 }
 0x62b   :  { %v3061_v22 = vrot.slane %v3060_v15, 1  ;;  %v3074_v44 = vrot.slane %v3073_v24, 1 }
 0x62d   :  { %v3062_v23 = vadd.f32 %v3061_v22, %v3060_v15  ;;  %v3075_v47 = vadd.f32 %v3074_v44, %v3073_v24 }
 0x62f   :  { %v3076_v18 = vmul.f32 %v3062_v23, %v3062_v23  ;;  %v3077_v3 = vmul.f32 %v3075_v47, %v3075_v47 }
 0x631   :  { %v3078_v0 = vadd.f32 %v3077_v3, %v3076_v18 }
 0x633   :  { %3079 = vst [vmem:[#allocation10] sm:$0x1] %v3078_v0 }
 0x634   :  { %3366 = shalt.err (!%p3363_p8)
}
 0x635   :  { %s3367_s5 = scalar_lea.hbm %s4500_s9, 16 }
 0x636   :  { %p3368_p9 = scmp.ne.s32.totalorder %s4500_s9, %s3367_s5  ;;  %p3371_p10 = scmp.lt.u32.totalorder %s3367_s5, %s4500_s9 }
 0x638   :  { %p3373_p11 = pnand %p3371_p10, %p3368_p9 }
 0x63a   :  { %3376 = shalt.err (!%p3373_p11)
}
 0x63b   :  { %3089 = dma.vmem_to_hbm [thread:$0]  %s3087_s14, 16, %s4500_s9, [#allocation4]  }
 0x63c   :  { %3383 = dma.done.wait [#allocation4], 16  }
 0x63d   :  { %3384 = vsyncadd [#allocation4], 4294967280 }
 0x63e   :  { %3093 = vsyncpa [#allocation3], 1 }
 0x63f   :  { %3094 = vsyncpa [#allocation6], 1 }
 0x640   :  { %3095 = vsyncpa [#allocation9], 1 }
 0x641   :  { %3096 = vsyncpa [#allocation4], 1 }

</bundles_post_ra>
